<compile_context>
chip_gen: v6e
topology: v6e:2x2x1
jax: 0.10.0
libtpu: 0.0.40
codegen_flags: <defaults>
</compile_context>

<pallas_src>
import numpy as np

import jax
import jax.numpy as jnp
from jax.experimental import pallas as pl
from jax.experimental.pallas import tpu as pltpu


# ---------------------------------------------------------------------------
# The fused whole-network kernel (one grid step == one image)
# ---------------------------------------------------------------------------
def _lenet_kernel(x_ref, w1e_ref, w1o_ref, b1_ref, w2e_ref, w2o_ref, b2_ref,
                  wf1_ref, bf1_ref, wf2_ref, bf2_ref, wf3_ref, bf3_ref,
                  o_ref, p1_ref, p2_ref):
    f32 = jnp.float32

    # ---- conv1 (3->6, 5x5) + ReLU + 2x2 max-pool --------------------------
    # x_ref block: [1, 32, 96], rows = image row h, cols = (w, c) with c minor.
    he = jnp.zeros((28, 84), f32)      # even output columns, cols = (ow/2, n)
    ho = jnp.zeros((28, 84), f32)      # odd  output columns
    for kh in range(5):
        xs = x_ref[0, pl.ds(kh, 28), :]                       # [28, 96]
        he = he + jnp.dot(xs, w1e_ref[kh], preferred_element_type=f32)
        ho = ho + jnp.dot(xs, w1o_ref[kh], preferred_element_type=f32)
    b1 = b1_ref[...]                                          # [1, 84]
    hc = jnp.maximum(jnp.maximum(he + b1, 0.0),               # ReLU, then max
                     jnp.maximum(ho + b1, 0.0))               # over ow pairs
    for i in range(14):                                       # max over oh pairs
        p1_ref[pl.ds(i, 1), :] = jnp.maximum(hc[2 * i:2 * i + 1, :],
                                             hc[2 * i + 1:2 * i + 2, :])
    # p1_ref: [14, 84], rows = pooled h, cols = (w, c) with 6 channels.

    # ---- conv2 (6->16, 5x5) + ReLU + 2x2 max-pool --------------------------
    he2 = jnp.zeros((10, 80), f32)
    ho2 = jnp.zeros((10, 80), f32)
    for kh in range(5):
        ps = p1_ref[pl.ds(kh, 10), :]                         # [10, 84]
        he2 = he2 + jnp.dot(ps, w2e_ref[kh], preferred_element_type=f32)
        ho2 = ho2 + jnp.dot(ps, w2o_ref[kh], preferred_element_type=f32)
    b2 = b2_ref[...]                                          # [1, 80]
    hc2 = jnp.maximum(jnp.maximum(he2 + b2, 0.0),
                      jnp.maximum(ho2 + b2, 0.0))             # [10, 80]
    for i in range(5):
        p2_ref[pl.ds(i, 1), :] = jnp.maximum(hc2[2 * i:2 * i + 1, :],
                                             hc2[2 * i + 1:2 * i + 2, :])
    # p2_ref: [5, 80], rows = pooled h, cols = (w, c) with 16 channels.

    # ---- fused FC head: fc1 (+ReLU) -> fc2 (+ReLU) -> fc3 ------------------
    acc = jnp.zeros((1, 120), f32)
    for r in range(5):        # fc1 as 5 row matmuls (flatten folded into wf1)
        acc = acc + jnp.dot(p2_ref[pl.ds(r, 1), :], wf1_ref[r],
                            preferred_element_type=f32)
    f1 = jnp.maximum(acc + bf1_ref[...], 0.0)                 # [1, 120]
    f2 = jnp.maximum(jnp.dot(f1, wf2_ref[...], preferred_element_type=f32)
                     + bf2_ref[...], 0.0)                     # [1, 84]
    f3 = jnp.dot(f2, wf3_ref[...], preferred_element_type=f32) + bf3_ref[...]
    o_ref[0] = f3.astype(o_ref.dtype)                         # [1, 10]


# ---------------------------------------------------------------------------
# One-time weight repacking (plain numpy, done once at parameter prep)
# ---------------------------------------------------------------------------
def _conv_rowmats(w, b, out_w):
    """Fold im2col + the even/odd output-column (width-pool) split into the
    conv weights.

    Matmul rows are (w_in, c_in)-flattened image rows; matmul columns are
    (w_out//2, c_out)-flattened.  Returns (W_even[K, in_w*IC, (out_w//2)*OC],
    W_odd[...], bias_cols[1, (out_w//2)*OC]).
    """
    w = np.asarray(w, np.float32)                  # [OC, IC, K, K]
    b = np.asarray(b, np.float32)
    OC, IC, K, _ = w.shape
    in_w = out_w + K - 1
    half = out_w // 2
    we = np.zeros((K, in_w * IC, half * OC), np.float32)
    wo = np.zeros((K, in_w * IC, half * OC), np.float32)
    for kh in range(K):
        for kw in range(K):
            wt = w[:, :, kh, kw].T                 # [IC, OC]
            for ow2 in range(half):
                re = (2 * ow2 + kw) * IC           # even output col: ow = 2*ow2
                ro = (2 * ow2 + 1 + kw) * IC       # odd  output col: ow = 2*ow2+1
                we[kh, re:re + IC, ow2 * OC:(ow2 + 1) * OC] = wt
                wo[kh, ro:ro + IC, ow2 * OC:(ow2 + 1) * OC] = wt
    bcol = np.tile(b, half).reshape(1, half * OC)
    return jnp.asarray(we), jnp.asarray(wo), jnp.asarray(bcol)


def prepare_params(p):
    """Repack PyTorch-layout params into matmul-ready matrices (one time)."""
    w1e, w1o, b1 = _conv_rowmats(p["conv1_w"], p["conv1_b"], out_w=28)
    w2e, w2o, b2 = _conv_rowmats(p["conv2_w"], p["conv2_b"], out_w=10)

    # fc1: fold torch.flatten(x, 1)'s (C, H, W) ordering into the weight and
    # split it by the 5 feature-map rows, so no in-kernel reshape is needed.
    f1 = np.asarray(p["fc1_w"], np.float32)        # [120, 400], cols = (c,h,w)
    wf1 = np.zeros((5, 80, 120), np.float32)
    for h in range(5):
        for w in range(5):
            for c in range(16):
                wf1[h, w * 16 + c, :] = f1[:, c * 25 + h * 5 + w]

    return {
        "w1e": w1e, "w1o": w1o, "b1": b1,
        "w2e": w2e, "w2o": w2o, "b2": b2,
        "wf1": jnp.asarray(wf1),
        "bf1": jnp.asarray(np.asarray(p["fc1_b"], np.float32).reshape(1, 120)),
        "wf2": jnp.asarray(np.asarray(p["fc2_w"], np.float32).T),   # [120, 84]
        "bf2": jnp.asarray(np.asarray(p["fc2_b"], np.float32).reshape(1, 84)),
        "wf3": jnp.asarray(np.asarray(p["fc3_w"], np.float32).T),   # [84, 10]
        "bf3": jnp.asarray(np.asarray(p["fc3_b"], np.float32).reshape(1, 10)),
    }


# ---------------------------------------------------------------------------
# Forward pass
# ---------------------------------------------------------------------------
def net_forward(packed, x):
    """Forward pass of Net.  x: NCHW [B, 3, 32, 32] -> [B, 10]."""
    B = x.shape[0]
    # Layout plumbing on the raw network input only: NCHW -> [B, h, (w, c)].
    x2d = jnp.transpose(x, (0, 2, 3, 1)).reshape(B, 32, 96).astype(jnp.float32)

    pin2 = lambda b: (0, 0)
    pin3 = lambda b: (0, 0, 0)
    out = pl.pallas_call(
        _lenet_kernel,
        out_shape=jax.ShapeDtypeStruct((B, 1, 10), jnp.float32),
        grid=(B,),
        in_specs=[
            pl.BlockSpec((1, 32, 96), lambda b: (b, 0, 0)),   # image b
            pl.BlockSpec(packed["w1e"].shape, pin3),
            pl.BlockSpec(packed["w1o"].shape, pin3),
            pl.BlockSpec(packed["b1"].shape, pin2),
            pl.BlockSpec(packed["w2e"].shape, pin3),
            pl.BlockSpec(packed["w2o"].shape, pin3),
            pl.BlockSpec(packed["b2"].shape, pin2),
            pl.BlockSpec(packed["wf1"].shape, pin3),
            pl.BlockSpec(packed["bf1"].shape, pin2),
            pl.BlockSpec(packed["wf2"].shape, pin2),
            pl.BlockSpec(packed["bf2"].shape, pin2),
            pl.BlockSpec(packed["wf3"].shape, pin2),
            pl.BlockSpec(packed["bf3"].shape, pin2),
        ],
        out_specs=pl.BlockSpec((1, 1, 10), lambda b: (b, 0, 0)),
        scratch_shapes=[pltpu.VMEM((14, 84), jnp.float32),    # pooled conv1
                        pltpu.VMEM((5, 80), jnp.float32)],    # pooled conv2
        compiler_params=pltpu.CompilerParams(
            dimension_semantics=("parallel",)),
    )(x2d, packed["w1e"], packed["w1o"], packed["b1"],
      packed["w2e"], packed["w2o"], packed["b2"],
      packed["wf1"], packed["bf1"], packed["wf2"], packed["bf2"],
      packed["wf3"], packed["bf3"])
    return out.reshape(B, 10)


# ---------------------------------------------------------------------------
# Params + pure-JAX reference (correctness check only)
# ---------------------------------------------------------------------------
def init_params(key):
    """Deterministic synthetic params, PyTorch-default-style uniform init."""
    def uinit(k, shape, fan_in):
        bound = 1.0 / float(fan_in) ** 0.5
        return jax.random.uniform(k, shape, jnp.float32, -bound, bound)

    ks = jax.random.split(key, 10)
    return {
        "conv1_w": uinit(ks[0], (6, 3, 5, 5), 3 * 5 * 5),
        "conv1_b": uinit(ks[1], (6,), 3 * 5 * 5),
        "conv2_w": uinit(ks[2], (16, 6, 5, 5), 6 * 5 * 5),
        "conv2_b": uinit(ks[3], (16,), 6 * 5 * 5),
        "fc1_w": uinit(ks[4], (120, 16 * 5 * 5), 16 * 5 * 5),
        "fc1_b": uinit(ks[5], (120,), 16 * 5 * 5),
        "fc2_w": uinit(ks[6], (84, 120), 120),
        "fc2_b": uinit(ks[7], (84,), 120),
        "fc3_w": uinit(ks[8], (10, 84), 84),
        "fc3_b": uinit(ks[9], (10,), 84),
    }


def net_forward_reference(p, x):
    """Pure-JAX reference (no Pallas)."""
    dn = ("NCHW", "OIHW", "NCHW")

    def conv(v, w, b):
        out = jax.lax.conv_general_dilated(v, w, (1, 1), "VALID",
                                           dimension_numbers=dn)
        return jax.nn.relu(out + b.reshape(1, -1, 1, 1))

    def pool(v):
        return jax.lax.reduce_window(v, -jnp.inf, jax.lax.max,
                                     (1, 1, 2, 2), (1, 1, 2, 2), "VALID")

    y = pool(conv(x, p["conv1_w"], p["conv1_b"]))
    y = pool(conv(y, p["conv2_w"], p["conv2_b"]))
    y = y.reshape(y.shape[0], -1)
    y = jax.nn.relu(y @ p["fc1_w"].T + p["fc1_b"])
    y = jax.nn.relu(y @ p["fc2_w"].T + p["fc2_b"])
    return y @ p["fc3_w"].T + p["fc3_b"]


if __name__ == "__main__":
    key = jax.random.PRNGKey(0)
    k_param, k_x = jax.random.split(key)
    params = init_params(k_param)
    packed = prepare_params(params)
    # CIFAR-10 sized input (32x32 is required by the 16*5*5 flatten).
    x = jax.random.normal(k_x, (2, 3, 32, 32), dtype=jnp.float32)

    fwd = jax.jit(net_forward)
    out = jax.block_until_ready(fwd(packed, x))
    ref = jax.block_until_ready(net_forward_reference(params, x))

    assert out.shape == (2, 10)
    assert jnp.allclose(out, ref, rtol=2e-3, atol=2e-3), "mismatch vs reference"
    print("KERNEL_OK")
</pallas_src>

<mosaic_0001>
module attributes {stable_mosaic.version = 11 : i64} {
  func.func @_lenet_kernel(%arg0: i32, %arg1: memref<1x32x96xf32, #tpu.memory_space<vmem>>, %arg2: memref<5x96x84xf32, #tpu.memory_space<vmem>>, %arg3: memref<5x96x84xf32, #tpu.memory_space<vmem>>, %arg4: memref<1x84xf32, #tpu.memory_space<vmem>>, %arg5: memref<5x84x80xf32, #tpu.memory_space<vmem>>, %arg6: memref<5x84x80xf32, #tpu.memory_space<vmem>>, %arg7: memref<1x80xf32, #tpu.memory_space<vmem>>, %arg8: memref<5x80x120xf32, #tpu.memory_space<vmem>>, %arg9: memref<1x120xf32, #tpu.memory_space<vmem>>, %arg10: memref<120x84xf32, #tpu.memory_space<vmem>>, %arg11: memref<1x84xf32, #tpu.memory_space<vmem>>, %arg12: memref<84x10xf32, #tpu.memory_space<vmem>>, %arg13: memref<1x10xf32, #tpu.memory_space<vmem>>, %arg14: memref<1x1x10xf32, #tpu.memory_space<vmem>>, %arg15: memref<14x84xf32, #tpu.memory_space<vmem>>, %arg16: memref<5x80xf32, #tpu.memory_space<vmem>>) attributes {dimension_semantics = [#tpu.dimension_semantics<parallel>], iteration_bounds = array<i64: 2>, scalar_prefetch = 0 : i64, scratch_operands = 2 : i64, tpu.core_type = #tpu.core_type<tc>, window_params = [{transform_indices = @transform_0, window_bounds = array<i64: 1, 32, 96>}, {pipeline_mode = #tpu.pipeline_mode<synchronous>, transform_indices = @transform_1, window_bounds = array<i64: 5, 96, 84>}, {pipeline_mode = #tpu.pipeline_mode<synchronous>, transform_indices = @transform_2, window_bounds = array<i64: 5, 96, 84>}, {pipeline_mode = #tpu.pipeline_mode<synchronous>, transform_indices = @transform_3, window_bounds = array<i64: 1, 84>}, {pipeline_mode = #tpu.pipeline_mode<synchronous>, transform_indices = @transform_4, window_bounds = array<i64: 5, 84, 80>}, {pipeline_mode = #tpu.pipeline_mode<synchronous>, transform_indices = @transform_5, window_bounds = array<i64: 5, 84, 80>}, {pipeline_mode = #tpu.pipeline_mode<synchronous>, transform_indices = @transform_6, window_bounds = array<i64: 1, 80>}, {pipeline_mode = #tpu.pipeline_mode<synchronous>, transform_indices = @transform_7, window_bounds = array<i64: 5, 80, 120>}, {pipeline_mode = #tpu.pipeline_mode<synchronous>, transform_indices = @transform_8, window_bounds = array<i64: 1, 120>}, {pipeline_mode = #tpu.pipeline_mode<synchronous>, transform_indices = @transform_9, window_bounds = array<i64: 120, 84>}, {pipeline_mode = #tpu.pipeline_mode<synchronous>, transform_indices = @transform_10, window_bounds = array<i64: 1, 84>}, {pipeline_mode = #tpu.pipeline_mode<synchronous>, transform_indices = @transform_11, window_bounds = array<i64: 84, 10>}, {pipeline_mode = #tpu.pipeline_mode<synchronous>, transform_indices = @transform_12, window_bounds = array<i64: 1, 10>}, {transform_indices = @transform_13, window_bounds = array<i64: 1, 1, 10>}]} {
    %cst = arith.constant 0.000000e+00 : f32
    %0 = vector.broadcast %cst : f32 to vector<28x84xf32>
    %cst_0 = arith.constant 0.000000e+00 : f32
    %1 = vector.broadcast %cst_0 : f32 to vector<28x84xf32>
    %c0 = arith.constant 0 : index
    %c0_1 = arith.constant 0 : index
    %c0_2 = arith.constant 0 : index
    %2 = vector.load %arg1[%c0, %c0_1, %c0_2] : memref<1x32x96xf32, #tpu.memory_space<vmem>>, vector<1x28x96xf32>
    %3 = vector.shape_cast %2 : vector<1x28x96xf32> to vector<28x96xf32>
    %c0_3 = arith.constant 0 : index
    %c0_4 = arith.constant 0 : index
    %c0_5 = arith.constant 0 : index
    %4 = vector.load %arg2[%c0_3, %c0_4, %c0_5] : memref<5x96x84xf32, #tpu.memory_space<vmem>>, vector<1x96x84xf32>
    %5 = vector.shape_cast %4 : vector<1x96x84xf32> to vector<96x84xf32>
    %cst_6 = arith.constant dense<0.000000e+00> : vector<28x84xf32>
    %6 = tpu.matmul %3, %5, %cst_6 {dimension_numbers = #tpu.dot_dimension_numbers<[1], [0], [0], [1], [0, 0, 1, 1], [], []>} : vector<28x96xf32>, vector<96x84xf32>, vector<28x84xf32> -> vector<28x84xf32>
    %7 = arith.addf %0, %6 : vector<28x84xf32>
    %c0_7 = arith.constant 0 : index
    %c0_8 = arith.constant 0 : index
    %c0_9 = arith.constant 0 : index
    %8 = vector.load %arg3[%c0_7, %c0_8, %c0_9] : memref<5x96x84xf32, #tpu.memory_space<vmem>>, vector<1x96x84xf32>
    %9 = vector.shape_cast %8 : vector<1x96x84xf32> to vector<96x84xf32>
    %cst_10 = arith.constant dense<0.000000e+00> : vector<28x84xf32>
    %10 = tpu.matmul %3, %9, %cst_10 {dimension_numbers = #tpu.dot_dimension_numbers<[1], [0], [0], [1], [0, 0, 1, 1], [], []>} : vector<28x96xf32>, vector<96x84xf32>, vector<28x84xf32> -> vector<28x84xf32>
    %11 = arith.addf %1, %10 : vector<28x84xf32>
    %c0_11 = arith.constant 0 : index
    %c1 = arith.constant 1 : index
    %c0_12 = arith.constant 0 : index
    %12 = vector.load %arg1[%c0_11, %c1, %c0_12] : memref<1x32x96xf32, #tpu.memory_space<vmem>>, vector<1x28x96xf32>
    %13 = vector.shape_cast %12 : vector<1x28x96xf32> to vector<28x96xf32>
    %c1_13 = arith.constant 1 : index
    %c0_14 = arith.constant 0 : index
    %c0_15 = arith.constant 0 : index
    %14 = vector.load %arg2[%c1_13, %c0_14, %c0_15] : memref<5x96x84xf32, #tpu.memory_space<vmem>>, vector<1x96x84xf32>
    %15 = vector.shape_cast %14 : vector<1x96x84xf32> to vector<96x84xf32>
    %cst_16 = arith.constant dense<0.000000e+00> : vector<28x84xf32>
    %16 = tpu.matmul %13, %15, %cst_16 {dimension_numbers = #tpu.dot_dimension_numbers<[1], [0], [0], [1], [0, 0, 1, 1], [], []>} : vector<28x96xf32>, vector<96x84xf32>, vector<28x84xf32> -> vector<28x84xf32>
    %17 = arith.addf %7, %16 : vector<28x84xf32>
    %c1_17 = arith.constant 1 : index
    %c0_18 = arith.constant 0 : index
    %c0_19 = arith.constant 0 : index
    %18 = vector.load %arg3[%c1_17, %c0_18, %c0_19] : memref<5x96x84xf32, #tpu.memory_space<vmem>>, vector<1x96x84xf32>
    %19 = vector.shape_cast %18 : vector<1x96x84xf32> to vector<96x84xf32>
    %cst_20 = arith.constant dense<0.000000e+00> : vector<28x84xf32>
    %20 = tpu.matmul %13, %19, %cst_20 {dimension_numbers = #tpu.dot_dimension_numbers<[1], [0], [0], [1], [0, 0, 1, 1], [], []>} : vector<28x96xf32>, vector<96x84xf32>, vector<28x84xf32> -> vector<28x84xf32>
    %21 = arith.addf %11, %20 : vector<28x84xf32>
    %c0_21 = arith.constant 0 : index
    %c2 = arith.constant 2 : index
    %c0_22 = arith.constant 0 : index
    %22 = vector.load %arg1[%c0_21, %c2, %c0_22] : memref<1x32x96xf32, #tpu.memory_space<vmem>>, vector<1x28x96xf32>
    %23 = vector.shape_cast %22 : vector<1x28x96xf32> to vector<28x96xf32>
    %c2_23 = arith.constant 2 : index
    %c0_24 = arith.constant 0 : index
    %c0_25 = arith.constant 0 : index
    %24 = vector.load %arg2[%c2_23, %c0_24, %c0_25] : memref<5x96x84xf32, #tpu.memory_space<vmem>>, vector<1x96x84xf32>
    %25 = vector.shape_cast %24 : vector<1x96x84xf32> to vector<96x84xf32>
    %cst_26 = arith.constant dense<0.000000e+00> : vector<28x84xf32>
    %26 = tpu.matmul %23, %25, %cst_26 {dimension_numbers = #tpu.dot_dimension_numbers<[1], [0], [0], [1], [0, 0, 1, 1], [], []>} : vector<28x96xf32>, vector<96x84xf32>, vector<28x84xf32> -> vector<28x84xf32>
    %27 = arith.addf %17, %26 : vector<28x84xf32>
    %c2_27 = arith.constant 2 : index
    %c0_28 = arith.constant 0 : index
    %c0_29 = arith.constant 0 : index
    %28 = vector.load %arg3[%c2_27, %c0_28, %c0_29] : memref<5x96x84xf32, #tpu.memory_space<vmem>>, vector<1x96x84xf32>
    %29 = vector.shape_cast %28 : vector<1x96x84xf32> to vector<96x84xf32>
    %cst_30 = arith.constant dense<0.000000e+00> : vector<28x84xf32>
    %30 = tpu.matmul %23, %29, %cst_30 {dimension_numbers = #tpu.dot_dimension_numbers<[1], [0], [0], [1], [0, 0, 1, 1], [], []>} : vector<28x96xf32>, vector<96x84xf32>, vector<28x84xf32> -> vector<28x84xf32>
    %31 = arith.addf %21, %30 : vector<28x84xf32>
    %c0_31 = arith.constant 0 : index
    %c3 = arith.constant 3 : index
    %c0_32 = arith.constant 0 : index
    %32 = vector.load %arg1[%c0_31, %c3, %c0_32] : memref<1x32x96xf32, #tpu.memory_space<vmem>>, vector<1x28x96xf32>
    %33 = vector.shape_cast %32 : vector<1x28x96xf32> to vector<28x96xf32>
    %c3_33 = arith.constant 3 : index
    %c0_34 = arith.constant 0 : index
    %c0_35 = arith.constant 0 : index
    %34 = vector.load %arg2[%c3_33, %c0_34, %c0_35] : memref<5x96x84xf32, #tpu.memory_space<vmem>>, vector<1x96x84xf32>
    %35 = vector.shape_cast %34 : vector<1x96x84xf32> to vector<96x84xf32>
    %cst_36 = arith.constant dense<0.000000e+00> : vector<28x84xf32>
    %36 = tpu.matmul %33, %35, %cst_36 {dimension_numbers = #tpu.dot_dimension_numbers<[1], [0], [0], [1], [0, 0, 1, 1], [], []>} : vector<28x96xf32>, vector<96x84xf32>, vector<28x84xf32> -> vector<28x84xf32>
    %37 = arith.addf %27, %36 : vector<28x84xf32>
    %c3_37 = arith.constant 3 : index
    %c0_38 = arith.constant 0 : index
    %c0_39 = arith.constant 0 : index
    %38 = vector.load %arg3[%c3_37, %c0_38, %c0_39] : memref<5x96x84xf32, #tpu.memory_space<vmem>>, vector<1x96x84xf32>
    %39 = vector.shape_cast %38 : vector<1x96x84xf32> to vector<96x84xf32>
    %cst_40 = arith.constant dense<0.000000e+00> : vector<28x84xf32>
    %40 = tpu.matmul %33, %39, %cst_40 {dimension_numbers = #tpu.dot_dimension_numbers<[1], [0], [0], [1], [0, 0, 1, 1], [], []>} : vector<28x96xf32>, vector<96x84xf32>, vector<28x84xf32> -> vector<28x84xf32>
    %41 = arith.addf %31, %40 : vector<28x84xf32>
    %c0_41 = arith.constant 0 : index
    %c4 = arith.constant 4 : index
    %c0_42 = arith.constant 0 : index
    %42 = vector.load %arg1[%c0_41, %c4, %c0_42] : memref<1x32x96xf32, #tpu.memory_space<vmem>>, vector<1x28x96xf32>
    %43 = vector.shape_cast %42 : vector<1x28x96xf32> to vector<28x96xf32>
    %c4_43 = arith.constant 4 : index
    %c0_44 = arith.constant 0 : index
    %c0_45 = arith.constant 0 : index
    %44 = vector.load %arg2[%c4_43, %c0_44, %c0_45] : memref<5x96x84xf32, #tpu.memory_space<vmem>>, vector<1x96x84xf32>
    %45 = vector.shape_cast %44 : vector<1x96x84xf32> to vector<96x84xf32>
    %cst_46 = arith.constant dense<0.000000e+00> : vector<28x84xf32>
    %46 = tpu.matmul %43, %45, %cst_46 {dimension_numbers = #tpu.dot_dimension_numbers<[1], [0], [0], [1], [0, 0, 1, 1], [], []>} : vector<28x96xf32>, vector<96x84xf32>, vector<28x84xf32> -> vector<28x84xf32>
    %47 = arith.addf %37, %46 : vector<28x84xf32>
    %c4_47 = arith.constant 4 : index
    %c0_48 = arith.constant 0 : index
    %c0_49 = arith.constant 0 : index
    %48 = vector.load %arg3[%c4_47, %c0_48, %c0_49] : memref<5x96x84xf32, #tpu.memory_space<vmem>>, vector<1x96x84xf32>
    %49 = vector.shape_cast %48 : vector<1x96x84xf32> to vector<96x84xf32>
    %cst_50 = arith.constant dense<0.000000e+00> : vector<28x84xf32>
    %50 = tpu.matmul %43, %49, %cst_50 {dimension_numbers = #tpu.dot_dimension_numbers<[1], [0], [0], [1], [0, 0, 1, 1], [], []>} : vector<28x96xf32>, vector<96x84xf32>, vector<28x84xf32> -> vector<28x84xf32>
    %51 = arith.addf %41, %50 : vector<28x84xf32>
    %c0_51 = arith.constant 0 : index
    %c0_52 = arith.constant 0 : index
    %52 = vector.load %arg4[%c0_51, %c0_52] : memref<1x84xf32, #tpu.memory_space<vmem>>, vector<1x84xf32>
    %53 = vector.broadcast %52 : vector<1x84xf32> to vector<28x84xf32>
    %54 = arith.addf %47, %53 : vector<28x84xf32>
    %cst_53 = arith.constant 0.000000e+00 : f32
    %55 = vector.broadcast %cst_53 : f32 to vector<28x84xf32>
    %56 = arith.maximumf %54, %55 : vector<28x84xf32>
    %57 = vector.broadcast %52 : vector<1x84xf32> to vector<28x84xf32>
    %58 = arith.addf %51, %57 : vector<28x84xf32>
    %cst_54 = arith.constant 0.000000e+00 : f32
    %59 = vector.broadcast %cst_54 : f32 to vector<28x84xf32>
    %60 = arith.maximumf %58, %59 : vector<28x84xf32>
    %61 = arith.maximumf %56, %60 : vector<28x84xf32>
    %62 = vector.extract_strided_slice %61 {offsets = [0, 0], sizes = [1, 84], strides = [1, 1]} : vector<28x84xf32> to vector<1x84xf32>
    %63 = vector.extract_strided_slice %61 {offsets = [1, 0], sizes = [1, 84], strides = [1, 1]} : vector<28x84xf32> to vector<1x84xf32>
    %64 = arith.maximumf %62, %63 : vector<1x84xf32>
    %c0_55 = arith.constant 0 : index
    %c0_56 = arith.constant 0 : index
    %65 = vector.load %arg15[%c0_55, %c0_56] : memref<14x84xf32, #tpu.memory_space<vmem>>, vector<1x84xf32>
    tpu.vector_store %arg15[%c0_55, %c0_56], %64 {strides = array<i32>} : memref<14x84xf32, #tpu.memory_space<vmem>>, vector<1x84xf32>,
    %66 = vector.extract_strided_slice %61 {offsets = [2, 0], sizes = [1, 84], strides = [1, 1]} : vector<28x84xf32> to vector<1x84xf32>
    %67 = vector.extract_strided_slice %61 {offsets = [3, 0], sizes = [1, 84], strides = [1, 1]} : vector<28x84xf32> to vector<1x84xf32>
    %68 = arith.maximumf %66, %67 : vector<1x84xf32>
    %c1_57 = arith.constant 1 : index
    %c0_58 = arith.constant 0 : index
    %69 = vector.load %arg15[%c1_57, %c0_58] : memref<14x84xf32, #tpu.memory_space<vmem>>, vector<1x84xf32>
    tpu.vector_store %arg15[%c1_57, %c0_58], %68 {strides = array<i32>} : memref<14x84xf32, #tpu.memory_space<vmem>>, vector<1x84xf32>,
    %70 = vector.extract_strided_slice %61 {offsets = [4, 0], sizes = [1, 84], strides = [1, 1]} : vector<28x84xf32> to vector<1x84xf32>
    %71 = vector.extract_strided_slice %61 {offsets = [5, 0], sizes = [1, 84], strides = [1, 1]} : vector<28x84xf32> to vector<1x84xf32>
    %72 = arith.maximumf %70, %71 : vector<1x84xf32>
    %c2_59 = arith.constant 2 : index
    %c0_60 = arith.constant 0 : index
    %73 = vector.load %arg15[%c2_59, %c0_60] : memref<14x84xf32, #tpu.memory_space<vmem>>, vector<1x84xf32>
    tpu.vector_store %arg15[%c2_59, %c0_60], %72 {strides = array<i32>} : memref<14x84xf32, #tpu.memory_space<vmem>>, vector<1x84xf32>,
    %74 = vector.extract_strided_slice %61 {offsets = [6, 0], sizes = [1, 84], strides = [1, 1]} : vector<28x84xf32> to vector<1x84xf32>
    %75 = vector.extract_strided_slice %61 {offsets = [7, 0], sizes = [1, 84], strides = [1, 1]} : vector<28x84xf32> to vector<1x84xf32>
    %76 = arith.maximumf %74, %75 : vector<1x84xf32>
    %c3_61 = arith.constant 3 : index
    %c0_62 = arith.constant 0 : index
    %77 = vector.load %arg15[%c3_61, %c0_62] : memref<14x84xf32, #tpu.memory_space<vmem>>, vector<1x84xf32>
    tpu.vector_store %arg15[%c3_61, %c0_62], %76 {strides = array<i32>} : memref<14x84xf32, #tpu.memory_space<vmem>>, vector<1x84xf32>,
    %78 = vector.extract_strided_slice %61 {offsets = [8, 0], sizes = [1, 84], strides = [1, 1]} : vector<28x84xf32> to vector<1x84xf32>
    %79 = vector.extract_strided_slice %61 {offsets = [9, 0], sizes = [1, 84], strides = [1, 1]} : vector<28x84xf32> to vector<1x84xf32>
    %80 = arith.maximumf %78, %79 : vector<1x84xf32>
    %c4_63 = arith.constant 4 : index
    %c0_64 = arith.constant 0 : index
    %81 = vector.load %arg15[%c4_63, %c0_64] : memref<14x84xf32, #tpu.memory_space<vmem>>, vector<1x84xf32>
    tpu.vector_store %arg15[%c4_63, %c0_64], %80 {strides = array<i32>} : memref<14x84xf32, #tpu.memory_space<vmem>>, vector<1x84xf32>,
    %82 = vector.extract_strided_slice %61 {offsets = [10, 0], sizes = [1, 84], strides = [1, 1]} : vector<28x84xf32> to vector<1x84xf32>
    %83 = vector.extract_strided_slice %61 {offsets = [11, 0], sizes = [1, 84], strides = [1, 1]} : vector<28x84xf32> to vector<1x84xf32>
    %84 = arith.maximumf %82, %83 : vector<1x84xf32>
    %c5 = arith.constant 5 : index
    %c0_65 = arith.constant 0 : index
    %85 = vector.load %arg15[%c5, %c0_65] : memref<14x84xf32, #tpu.memory_space<vmem>>, vector<1x84xf32>
    tpu.vector_store %arg15[%c5, %c0_65], %84 {strides = array<i32>} : memref<14x84xf32, #tpu.memory_space<vmem>>, vector<1x84xf32>,
    %86 = vector.extract_strided_slice %61 {offsets = [12, 0], sizes = [1, 84], strides = [1, 1]} : vector<28x84xf32> to vector<1x84xf32>
    %87 = vector.extract_strided_slice %61 {offsets = [13, 0], sizes = [1, 84], strides = [1, 1]} : vector<28x84xf32> to vector<1x84xf32>
    %88 = arith.maximumf %86, %87 : vector<1x84xf32>
    %c6 = arith.constant 6 : index
    %c0_66 = arith.constant 0 : index
    %89 = vector.load %arg15[%c6, %c0_66] : memref<14x84xf32, #tpu.memory_space<vmem>>, vector<1x84xf32>
    tpu.vector_store %arg15[%c6, %c0_66], %88 {strides = array<i32>} : memref<14x84xf32, #tpu.memory_space<vmem>>, vector<1x84xf32>,
    %90 = vector.extract_strided_slice %61 {offsets = [14, 0], sizes = [1, 84], strides = [1, 1]} : vector<28x84xf32> to vector<1x84xf32>
    %91 = vector.extract_strided_slice %61 {offsets = [15, 0], sizes = [1, 84], strides = [1, 1]} : vector<28x84xf32> to vector<1x84xf32>
    %92 = arith.maximumf %90, %91 : vector<1x84xf32>
    %c7 = arith.constant 7 : index
    %c0_67 = arith.constant 0 : index
    %93 = vector.load %arg15[%c7, %c0_67] : memref<14x84xf32, #tpu.memory_space<vmem>>, vector<1x84xf32>
    tpu.vector_store %arg15[%c7, %c0_67], %92 {strides = array<i32>} : memref<14x84xf32, #tpu.memory_space<vmem>>, vector<1x84xf32>,
    %94 = vector.extract_strided_slice %61 {offsets = [16, 0], sizes = [1, 84], strides = [1, 1]} : vector<28x84xf32> to vector<1x84xf32>
    %95 = vector.extract_strided_slice %61 {offsets = [17, 0], sizes = [1, 84], strides = [1, 1]} : vector<28x84xf32> to vector<1x84xf32>
    %96 = arith.maximumf %94, %95 : vector<1x84xf32>
    %c8 = arith.constant 8 : index
    %c0_68 = arith.constant 0 : index
    %97 = vector.load %arg15[%c8, %c0_68] : memref<14x84xf32, #tpu.memory_space<vmem>>, vector<1x84xf32>
    tpu.vector_store %arg15[%c8, %c0_68], %96 {strides = array<i32>} : memref<14x84xf32, #tpu.memory_space<vmem>>, vector<1x84xf32>,
    %98 = vector.extract_strided_slice %61 {offsets = [18, 0], sizes = [1, 84], strides = [1, 1]} : vector<28x84xf32> to vector<1x84xf32>
    %99 = vector.extract_strided_slice %61 {offsets = [19, 0], sizes = [1, 84], strides = [1, 1]} : vector<28x84xf32> to vector<1x84xf32>
    %100 = arith.maximumf %98, %99 : vector<1x84xf32>
    %c9 = arith.constant 9 : index
    %c0_69 = arith.constant 0 : index
    %101 = vector.load %arg15[%c9, %c0_69] : memref<14x84xf32, #tpu.memory_space<vmem>>, vector<1x84xf32>
    tpu.vector_store %arg15[%c9, %c0_69], %100 {strides = array<i32>} : memref<14x84xf32, #tpu.memory_space<vmem>>, vector<1x84xf32>,
    %102 = vector.extract_strided_slice %61 {offsets = [20, 0], sizes = [1, 84], strides = [1, 1]} : vector<28x84xf32> to vector<1x84xf32>
    %103 = vector.extract_strided_slice %61 {offsets = [21, 0], sizes = [1, 84], strides = [1, 1]} : vector<28x84xf32> to vector<1x84xf32>
    %104 = arith.maximumf %102, %103 : vector<1x84xf32>
    %c10 = arith.constant 10 : index
    %c0_70 = arith.constant 0 : index
    %105 = vector.load %arg15[%c10, %c0_70] : memref<14x84xf32, #tpu.memory_space<vmem>>, vector<1x84xf32>
    tpu.vector_store %arg15[%c10, %c0_70], %104 {strides = array<i32>} : memref<14x84xf32, #tpu.memory_space<vmem>>, vector<1x84xf32>,
    %106 = vector.extract_strided_slice %61 {offsets = [22, 0], sizes = [1, 84], strides = [1, 1]} : vector<28x84xf32> to vector<1x84xf32>
    %107 = vector.extract_strided_slice %61 {offsets = [23, 0], sizes = [1, 84], strides = [1, 1]} : vector<28x84xf32> to vector<1x84xf32>
    %108 = arith.maximumf %106, %107 : vector<1x84xf32>
    %c11 = arith.constant 11 : index
    %c0_71 = arith.constant 0 : index
    %109 = vector.load %arg15[%c11, %c0_71] : memref<14x84xf32, #tpu.memory_space<vmem>>, vector<1x84xf32>
    tpu.vector_store %arg15[%c11, %c0_71], %108 {strides = array<i32>} : memref<14x84xf32, #tpu.memory_space<vmem>>, vector<1x84xf32>,
    %110 = vector.extract_strided_slice %61 {offsets = [24, 0], sizes = [1, 84], strides = [1, 1]} : vector<28x84xf32> to vector<1x84xf32>
    %111 = vector.extract_strided_slice %61 {offsets = [25, 0], sizes = [1, 84], strides = [1, 1]} : vector<28x84xf32> to vector<1x84xf32>
    %112 = arith.maximumf %110, %111 : vector<1x84xf32>
    %c12 = arith.constant 12 : index
    %c0_72 = arith.constant 0 : index
    %113 = vector.load %arg15[%c12, %c0_72] : memref<14x84xf32, #tpu.memory_space<vmem>>, vector<1x84xf32>
    tpu.vector_store %arg15[%c12, %c0_72], %112 {strides = array<i32>} : memref<14x84xf32, #tpu.memory_space<vmem>>, vector<1x84xf32>,
    %114 = vector.extract_strided_slice %61 {offsets = [26, 0], sizes = [1, 84], strides = [1, 1]} : vector<28x84xf32> to vector<1x84xf32>
    %115 = vector.extract_strided_slice %61 {offsets = [27, 0], sizes = [1, 84], strides = [1, 1]} : vector<28x84xf32> to vector<1x84xf32>
    %116 = arith.maximumf %114, %115 : vector<1x84xf32>
    %c13 = arith.constant 13 : index
    %c0_73 = arith.constant 0 : index
    %117 = vector.load %arg15[%c13, %c0_73] : memref<14x84xf32, #tpu.memory_space<vmem>>, vector<1x84xf32>
    tpu.vector_store %arg15[%c13, %c0_73], %116 {strides = array<i32>} : memref<14x84xf32, #tpu.memory_space<vmem>>, vector<1x84xf32>,
    %cst_74 = arith.constant 0.000000e+00 : f32
    %118 = vector.broadcast %cst_74 : f32 to vector<10x80xf32>
    %cst_75 = arith.constant 0.000000e+00 : f32
    %119 = vector.broadcast %cst_75 : f32 to vector<10x80xf32>
    %c0_76 = arith.constant 0 : index
    %c0_77 = arith.constant 0 : index
    %120 = vector.load %arg15[%c0_76, %c0_77] : memref<14x84xf32, #tpu.memory_space<vmem>>, vector<10x84xf32>
    %c0_78 = arith.constant 0 : index
    %c0_79 = arith.constant 0 : index
    %c0_80 = arith.constant 0 : index
    %121 = vector.load %arg5[%c0_78, %c0_79, %c0_80] : memref<5x84x80xf32, #tpu.memory_space<vmem>>, vector<1x84x80xf32>
    %122 = vector.shape_cast %121 : vector<1x84x80xf32> to vector<84x80xf32>
    %cst_81 = arith.constant dense<0.000000e+00> : vector<10x80xf32>
    %123 = tpu.matmul %120, %122, %cst_81 {dimension_numbers = #tpu.dot_dimension_numbers<[1], [0], [0], [1], [0, 0, 1, 1], [], []>} : vector<10x84xf32>, vector<84x80xf32>, vector<10x80xf32> -> vector<10x80xf32>
    %124 = arith.addf %118, %123 : vector<10x80xf32>
    %c0_82 = arith.constant 0 : index
    %c0_83 = arith.constant 0 : index
    %c0_84 = arith.constant 0 : index
    %125 = vector.load %arg6[%c0_82, %c0_83, %c0_84] : memref<5x84x80xf32, #tpu.memory_space<vmem>>, vector<1x84x80xf32>
    %126 = vector.shape_cast %125 : vector<1x84x80xf32> to vector<84x80xf32>
    %cst_85 = arith.constant dense<0.000000e+00> : vector<10x80xf32>
    %127 = tpu.matmul %120, %126, %cst_85 {dimension_numbers = #tpu.dot_dimension_numbers<[1], [0], [0], [1], [0, 0, 1, 1], [], []>} : vector<10x84xf32>, vector<84x80xf32>, vector<10x80xf32> -> vector<10x80xf32>
    %128 = arith.addf %119, %127 : vector<10x80xf32>
    %c1_86 = arith.constant 1 : index
    %c0_87 = arith.constant 0 : index
    %129 = vector.load %arg15[%c1_86, %c0_87] : memref<14x84xf32, #tpu.memory_space<vmem>>, vector<10x84xf32>
    %c1_88 = arith.constant 1 : index
    %c0_89 = arith.constant 0 : index
    %c0_90 = arith.constant 0 : index
    %130 = vector.load %arg5[%c1_88, %c0_89, %c0_90] : memref<5x84x80xf32, #tpu.memory_space<vmem>>, vector<1x84x80xf32>
    %131 = vector.shape_cast %130 : vector<1x84x80xf32> to vector<84x80xf32>
    %cst_91 = arith.constant dense<0.000000e+00> : vector<10x80xf32>
    %132 = tpu.matmul %129, %131, %cst_91 {dimension_numbers = #tpu.dot_dimension_numbers<[1], [0], [0], [1], [0, 0, 1, 1], [], []>} : vector<10x84xf32>, vector<84x80xf32>, vector<10x80xf32> -> vector<10x80xf32>
    %133 = arith.addf %124, %132 : vector<10x80xf32>
    %c1_92 = arith.constant 1 : index
    %c0_93 = arith.constant 0 : index
    %c0_94 = arith.constant 0 : index
    %134 = vector.load %arg6[%c1_92, %c0_93, %c0_94] : memref<5x84x80xf32, #tpu.memory_space<vmem>>, vector<1x84x80xf32>
    %135 = vector.shape_cast %134 : vector<1x84x80xf32> to vector<84x80xf32>
    %cst_95 = arith.constant dense<0.000000e+00> : vector<10x80xf32>
    %136 = tpu.matmul %129, %135, %cst_95 {dimension_numbers = #tpu.dot_dimension_numbers<[1], [0], [0], [1], [0, 0, 1, 1], [], []>} : vector<10x84xf32>, vector<84x80xf32>, vector<10x80xf32> -> vector<10x80xf32>
    %137 = arith.addf %128, %136 : vector<10x80xf32>
    %c2_96 = arith.constant 2 : index
    %c0_97 = arith.constant 0 : index
    %138 = vector.load %arg15[%c2_96, %c0_97] : memref<14x84xf32, #tpu.memory_space<vmem>>, vector<10x84xf32>
    %c2_98 = arith.constant 2 : index
    %c0_99 = arith.constant 0 : index
    %c0_100 = arith.constant 0 : index
    %139 = vector.load %arg5[%c2_98, %c0_99, %c0_100] : memref<5x84x80xf32, #tpu.memory_space<vmem>>, vector<1x84x80xf32>
    %140 = vector.shape_cast %139 : vector<1x84x80xf32> to vector<84x80xf32>
    %cst_101 = arith.constant dense<0.000000e+00> : vector<10x80xf32>
    %141 = tpu.matmul %138, %140, %cst_101 {dimension_numbers = #tpu.dot_dimension_numbers<[1], [0], [0], [1], [0, 0, 1, 1], [], []>} : vector<10x84xf32>, vector<84x80xf32>, vector<10x80xf32> -> vector<10x80xf32>
    %142 = arith.addf %133, %141 : vector<10x80xf32>
    %c2_102 = arith.constant 2 : index
    %c0_103 = arith.constant 0 : index
    %c0_104 = arith.constant 0 : index
    %143 = vector.load %arg6[%c2_102, %c0_103, %c0_104] : memref<5x84x80xf32, #tpu.memory_space<vmem>>, vector<1x84x80xf32>
    %144 = vector.shape_cast %143 : vector<1x84x80xf32> to vector<84x80xf32>
    %cst_105 = arith.constant dense<0.000000e+00> : vector<10x80xf32>
    %145 = tpu.matmul %138, %144, %cst_105 {dimension_numbers = #tpu.dot_dimension_numbers<[1], [0], [0], [1], [0, 0, 1, 1], [], []>} : vector<10x84xf32>, vector<84x80xf32>, vector<10x80xf32> -> vector<10x80xf32>
    %146 = arith.addf %137, %145 : vector<10x80xf32>
    %c3_106 = arith.constant 3 : index
    %c0_107 = arith.constant 0 : index
    %147 = vector.load %arg15[%c3_106, %c0_107] : memref<14x84xf32, #tpu.memory_space<vmem>>, vector<10x84xf32>
    %c3_108 = arith.constant 3 : index
    %c0_109 = arith.constant 0 : index
    %c0_110 = arith.constant 0 : index
    %148 = vector.load %arg5[%c3_108, %c0_109, %c0_110] : memref<5x84x80xf32, #tpu.memory_space<vmem>>, vector<1x84x80xf32>
    %149 = vector.shape_cast %148 : vector<1x84x80xf32> to vector<84x80xf32>
    %cst_111 = arith.constant dense<0.000000e+00> : vector<10x80xf32>
    %150 = tpu.matmul %147, %149, %cst_111 {dimension_numbers = #tpu.dot_dimension_numbers<[1], [0], [0], [1], [0, 0, 1, 1], [], []>} : vector<10x84xf32>, vector<84x80xf32>, vector<10x80xf32> -> vector<10x80xf32>
    %151 = arith.addf %142, %150 : vector<10x80xf32>
    %c3_112 = arith.constant 3 : index
    %c0_113 = arith.constant 0 : index
    %c0_114 = arith.constant 0 : index
    %152 = vector.load %arg6[%c3_112, %c0_113, %c0_114] : memref<5x84x80xf32, #tpu.memory_space<vmem>>, vector<1x84x80xf32>
    %153 = vector.shape_cast %152 : vector<1x84x80xf32> to vector<84x80xf32>
    %cst_115 = arith.constant dense<0.000000e+00> : vector<10x80xf32>
    %154 = tpu.matmul %147, %153, %cst_115 {dimension_numbers = #tpu.dot_dimension_numbers<[1], [0], [0], [1], [0, 0, 1, 1], [], []>} : vector<10x84xf32>, vector<84x80xf32>, vector<10x80xf32> -> vector<10x80xf32>
    %155 = arith.addf %146, %154 : vector<10x80xf32>
    %c4_116 = arith.constant 4 : index
    %c0_117 = arith.constant 0 : index
    %156 = vector.load %arg15[%c4_116, %c0_117] : memref<14x84xf32, #tpu.memory_space<vmem>>, vector<10x84xf32>
    %c4_118 = arith.constant 4 : index
    %c0_119 = arith.constant 0 : index
    %c0_120 = arith.constant 0 : index
    %157 = vector.load %arg5[%c4_118, %c0_119, %c0_120] : memref<5x84x80xf32, #tpu.memory_space<vmem>>, vector<1x84x80xf32>
    %158 = vector.shape_cast %157 : vector<1x84x80xf32> to vector<84x80xf32>
    %cst_121 = arith.constant dense<0.000000e+00> : vector<10x80xf32>
    %159 = tpu.matmul %156, %158, %cst_121 {dimension_numbers = #tpu.dot_dimension_numbers<[1], [0], [0], [1], [0, 0, 1, 1], [], []>} : vector<10x84xf32>, vector<84x80xf32>, vector<10x80xf32> -> vector<10x80xf32>
    %160 = arith.addf %151, %159 : vector<10x80xf32>
    %c4_122 = arith.constant 4 : index
    %c0_123 = arith.constant 0 : index
    %c0_124 = arith.constant 0 : index
    %161 = vector.load %arg6[%c4_122, %c0_123, %c0_124] : memref<5x84x80xf32, #tpu.memory_space<vmem>>, vector<1x84x80xf32>
    %162 = vector.shape_cast %161 : vector<1x84x80xf32> to vector<84x80xf32>
    %cst_125 = arith.constant dense<0.000000e+00> : vector<10x80xf32>
    %163 = tpu.matmul %156, %162, %cst_125 {dimension_numbers = #tpu.dot_dimension_numbers<[1], [0], [0], [1], [0, 0, 1, 1], [], []>} : vector<10x84xf32>, vector<84x80xf32>, vector<10x80xf32> -> vector<10x80xf32>
    %164 = arith.addf %155, %163 : vector<10x80xf32>
    %c0_126 = arith.constant 0 : index
    %c0_127 = arith.constant 0 : index
    %165 = vector.load %arg7[%c0_126, %c0_127] : memref<1x80xf32, #tpu.memory_space<vmem>>, vector<1x80xf32>
    %166 = vector.broadcast %165 : vector<1x80xf32> to vector<10x80xf32>
    %167 = arith.addf %160, %166 : vector<10x80xf32>
    %cst_128 = arith.constant 0.000000e+00 : f32
    %168 = vector.broadcast %cst_128 : f32 to vector<10x80xf32>
    %169 = arith.maximumf %167, %168 : vector<10x80xf32>
    %170 = vector.broadcast %165 : vector<1x80xf32> to vector<10x80xf32>
    %171 = arith.addf %164, %170 : vector<10x80xf32>
    %cst_129 = arith.constant 0.000000e+00 : f32
    %172 = vector.broadcast %cst_129 : f32 to vector<10x80xf32>
    %173 = arith.maximumf %171, %172 : vector<10x80xf32>
    %174 = arith.maximumf %169, %173 : vector<10x80xf32>
    %175 = vector.extract_strided_slice %174 {offsets = [0, 0], sizes = [1, 80], strides = [1, 1]} : vector<10x80xf32> to vector<1x80xf32>
    %176 = vector.extract_strided_slice %174 {offsets = [1, 0], sizes = [1, 80], strides = [1, 1]} : vector<10x80xf32> to vector<1x80xf32>
    %177 = arith.maximumf %175, %176 : vector<1x80xf32>
    %c0_130 = arith.constant 0 : index
    %c0_131 = arith.constant 0 : index
    %178 = vector.load %arg16[%c0_130, %c0_131] : memref<5x80xf32, #tpu.memory_space<vmem>>, vector<1x80xf32>
    tpu.vector_store %arg16[%c0_130, %c0_131], %177 {strides = array<i32>} : memref<5x80xf32, #tpu.memory_space<vmem>>, vector<1x80xf32>,
    %179 = vector.extract_strided_slice %174 {offsets = [2, 0], sizes = [1, 80], strides = [1, 1]} : vector<10x80xf32> to vector<1x80xf32>
    %180 = vector.extract_strided_slice %174 {offsets = [3, 0], sizes = [1, 80], strides = [1, 1]} : vector<10x80xf32> to vector<1x80xf32>
    %181 = arith.maximumf %179, %180 : vector<1x80xf32>
    %c1_132 = arith.constant 1 : index
    %c0_133 = arith.constant 0 : index
    %182 = vector.load %arg16[%c1_132, %c0_133] : memref<5x80xf32, #tpu.memory_space<vmem>>, vector<1x80xf32>
    tpu.vector_store %arg16[%c1_132, %c0_133], %181 {strides = array<i32>} : memref<5x80xf32, #tpu.memory_space<vmem>>, vector<1x80xf32>,
    %183 = vector.extract_strided_slice %174 {offsets = [4, 0], sizes = [1, 80], strides = [1, 1]} : vector<10x80xf32> to vector<1x80xf32>
    %184 = vector.extract_strided_slice %174 {offsets = [5, 0], sizes = [1, 80], strides = [1, 1]} : vector<10x80xf32> to vector<1x80xf32>
    %185 = arith.maximumf %183, %184 : vector<1x80xf32>
    %c2_134 = arith.constant 2 : index
    %c0_135 = arith.constant 0 : index
    %186 = vector.load %arg16[%c2_134, %c0_135] : memref<5x80xf32, #tpu.memory_space<vmem>>, vector<1x80xf32>
    tpu.vector_store %arg16[%c2_134, %c0_135], %185 {strides = array<i32>} : memref<5x80xf32, #tpu.memory_space<vmem>>, vector<1x80xf32>,
    %187 = vector.extract_strided_slice %174 {offsets = [6, 0], sizes = [1, 80], strides = [1, 1]} : vector<10x80xf32> to vector<1x80xf32>
    %188 = vector.extract_strided_slice %174 {offsets = [7, 0], sizes = [1, 80], strides = [1, 1]} : vector<10x80xf32> to vector<1x80xf32>
    %189 = arith.maximumf %187, %188 : vector<1x80xf32>
    %c3_136 = arith.constant 3 : index
    %c0_137 = arith.constant 0 : index
    %190 = vector.load %arg16[%c3_136, %c0_137] : memref<5x80xf32, #tpu.memory_space<vmem>>, vector<1x80xf32>
    tpu.vector_store %arg16[%c3_136, %c0_137], %189 {strides = array<i32>} : memref<5x80xf32, #tpu.memory_space<vmem>>, vector<1x80xf32>,
    %191 = vector.extract_strided_slice %174 {offsets = [8, 0], sizes = [1, 80], strides = [1, 1]} : vector<10x80xf32> to vector<1x80xf32>
    %192 = vector.extract_strided_slice %174 {offsets = [9, 0], sizes = [1, 80], strides = [1, 1]} : vector<10x80xf32> to vector<1x80xf32>
    %193 = arith.maximumf %191, %192 : vector<1x80xf32>
    %c4_138 = arith.constant 4 : index
    %c0_139 = arith.constant 0 : index
    %194 = vector.load %arg16[%c4_138, %c0_139] : memref<5x80xf32, #tpu.memory_space<vmem>>, vector<1x80xf32>
    tpu.vector_store %arg16[%c4_138, %c0_139], %193 {strides = array<i32>} : memref<5x80xf32, #tpu.memory_space<vmem>>, vector<1x80xf32>,
    %cst_140 = arith.constant 0.000000e+00 : f32
    %195 = vector.broadcast %cst_140 : f32 to vector<1x120xf32>
    %c0_141 = arith.constant 0 : index
    %c0_142 = arith.constant 0 : index
    %196 = vector.load %arg16[%c0_141, %c0_142] : memref<5x80xf32, #tpu.memory_space<vmem>>, vector<1x80xf32>
    %c0_143 = arith.constant 0 : index
    %c0_144 = arith.constant 0 : index
    %c0_145 = arith.constant 0 : index
    %197 = vector.load %arg8[%c0_143, %c0_144, %c0_145] : memref<5x80x120xf32, #tpu.memory_space<vmem>>, vector<1x80x120xf32>
    %198 = vector.shape_cast %197 : vector<1x80x120xf32> to vector<80x120xf32>
    %cst_146 = arith.constant dense<0.000000e+00> : vector<1x120xf32>
    %199 = tpu.matmul %196, %198, %cst_146 {dimension_numbers = #tpu.dot_dimension_numbers<[1], [0], [0], [1], [0, 0, 1, 1], [], []>} : vector<1x80xf32>, vector<80x120xf32>, vector<1x120xf32> -> vector<1x120xf32>
    %200 = arith.addf %195, %199 : vector<1x120xf32>
    %c1_147 = arith.constant 1 : index
    %c0_148 = arith.constant 0 : index
    %201 = vector.load %arg16[%c1_147, %c0_148] : memref<5x80xf32, #tpu.memory_space<vmem>>, vector<1x80xf32>
    %c1_149 = arith.constant 1 : index
    %c0_150 = arith.constant 0 : index
    %c0_151 = arith.constant 0 : index
    %202 = vector.load %arg8[%c1_149, %c0_150, %c0_151] : memref<5x80x120xf32, #tpu.memory_space<vmem>>, vector<1x80x120xf32>
    %203 = vector.shape_cast %202 : vector<1x80x120xf32> to vector<80x120xf32>
    %cst_152 = arith.constant dense<0.000000e+00> : vector<1x120xf32>
    %204 = tpu.matmul %201, %203, %cst_152 {dimension_numbers = #tpu.dot_dimension_numbers<[1], [0], [0], [1], [0, 0, 1, 1], [], []>} : vector<1x80xf32>, vector<80x120xf32>, vector<1x120xf32> -> vector<1x120xf32>
    %205 = arith.addf %200, %204 : vector<1x120xf32>
    %c2_153 = arith.constant 2 : index
    %c0_154 = arith.constant 0 : index
    %206 = vector.load %arg16[%c2_153, %c0_154] : memref<5x80xf32, #tpu.memory_space<vmem>>, vector<1x80xf32>
    %c2_155 = arith.constant 2 : index
    %c0_156 = arith.constant 0 : index
    %c0_157 = arith.constant 0 : index
    %207 = vector.load %arg8[%c2_155, %c0_156, %c0_157] : memref<5x80x120xf32, #tpu.memory_space<vmem>>, vector<1x80x120xf32>
    %208 = vector.shape_cast %207 : vector<1x80x120xf32> to vector<80x120xf32>
    %cst_158 = arith.constant dense<0.000000e+00> : vector<1x120xf32>
    %209 = tpu.matmul %206, %208, %cst_158 {dimension_numbers = #tpu.dot_dimension_numbers<[1], [0], [0], [1], [0, 0, 1, 1], [], []>} : vector<1x80xf32>, vector<80x120xf32>, vector<1x120xf32> -> vector<1x120xf32>
    %210 = arith.addf %205, %209 : vector<1x120xf32>
    %c3_159 = arith.constant 3 : index
    %c0_160 = arith.constant 0 : index
    %211 = vector.load %arg16[%c3_159, %c0_160] : memref<5x80xf32, #tpu.memory_space<vmem>>, vector<1x80xf32>
    %c3_161 = arith.constant 3 : index
    %c0_162 = arith.constant 0 : index
    %c0_163 = arith.constant 0 : index
    %212 = vector.load %arg8[%c3_161, %c0_162, %c0_163] : memref<5x80x120xf32, #tpu.memory_space<vmem>>, vector<1x80x120xf32>
    %213 = vector.shape_cast %212 : vector<1x80x120xf32> to vector<80x120xf32>
    %cst_164 = arith.constant dense<0.000000e+00> : vector<1x120xf32>
    %214 = tpu.matmul %211, %213, %cst_164 {dimension_numbers = #tpu.dot_dimension_numbers<[1], [0], [0], [1], [0, 0, 1, 1], [], []>} : vector<1x80xf32>, vector<80x120xf32>, vector<1x120xf32> -> vector<1x120xf32>
    %215 = arith.addf %210, %214 : vector<1x120xf32>
    %c4_165 = arith.constant 4 : index
    %c0_166 = arith.constant 0 : index
    %216 = vector.load %arg16[%c4_165, %c0_166] : memref<5x80xf32, #tpu.memory_space<vmem>>, vector<1x80xf32>
    %c4_167 = arith.constant 4 : index
    %c0_168 = arith.constant 0 : index
    %c0_169 = arith.constant 0 : index
    %217 = vector.load %arg8[%c4_167, %c0_168, %c0_169] : memref<5x80x120xf32, #tpu.memory_space<vmem>>, vector<1x80x120xf32>
    %218 = vector.shape_cast %217 : vector<1x80x120xf32> to vector<80x120xf32>
    %cst_170 = arith.constant dense<0.000000e+00> : vector<1x120xf32>
    %219 = tpu.matmul %216, %218, %cst_170 {dimension_numbers = #tpu.dot_dimension_numbers<[1], [0], [0], [1], [0, 0, 1, 1], [], []>} : vector<1x80xf32>, vector<80x120xf32>, vector<1x120xf32> -> vector<1x120xf32>
    %220 = arith.addf %215, %219 : vector<1x120xf32>
    %c0_171 = arith.constant 0 : index
    %c0_172 = arith.constant 0 : index
    %221 = vector.load %arg9[%c0_171, %c0_172] : memref<1x120xf32, #tpu.memory_space<vmem>>, vector<1x120xf32>
    %222 = arith.addf %220, %221 : vector<1x120xf32>
    %cst_173 = arith.constant 0.000000e+00 : f32
    %223 = vector.broadcast %cst_173 : f32 to vector<1x120xf32>
    %224 = arith.maximumf %222, %223 : vector<1x120xf32>
    %c0_174 = arith.constant 0 : index
    %c0_175 = arith.constant 0 : index
    %225 = vector.load %arg10[%c0_174, %c0_175] : memref<120x84xf32, #tpu.memory_space<vmem>>, vector<120x84xf32>
    %cst_176 = arith.constant dense<0.000000e+00> : vector<1x84xf32>
    %226 = tpu.matmul %224, %225, %cst_176 {dimension_numbers = #tpu.dot_dimension_numbers<[1], [0], [0], [1], [0, 0, 1, 1], [], []>} : vector<1x120xf32>, vector<120x84xf32>, vector<1x84xf32> -> vector<1x84xf32>
    %c0_177 = arith.constant 0 : index
    %c0_178 = arith.constant 0 : index
    %227 = vector.load %arg11[%c0_177, %c0_178] : memref<1x84xf32, #tpu.memory_space<vmem>>, vector<1x84xf32>
    %228 = arith.addf %226, %227 : vector<1x84xf32>
    %cst_179 = arith.constant 0.000000e+00 : f32
    %229 = vector.broadcast %cst_179 : f32 to vector<1x84xf32>
    %230 = arith.maximumf %228, %229 : vector<1x84xf32>
    %c0_180 = arith.constant 0 : index
    %c0_181 = arith.constant 0 : index
    %231 = vector.load %arg12[%c0_180, %c0_181] : memref<84x10xf32, #tpu.memory_space<vmem>>, vector<84x10xf32>
    %cst_182 = arith.constant dense<0.000000e+00> : vector<1x10xf32>
    %232 = tpu.matmul %230, %231, %cst_182 {dimension_numbers = #tpu.dot_dimension_numbers<[1], [0], [0], [1], [0, 0, 1, 1], [], []>} : vector<1x84xf32>, vector<84x10xf32>, vector<1x10xf32> -> vector<1x10xf32>
    %c0_183 = arith.constant 0 : index
    %c0_184 = arith.constant 0 : index
    %233 = vector.load %arg13[%c0_183, %c0_184] : memref<1x10xf32, #tpu.memory_space<vmem>>, vector<1x10xf32>
    %234 = arith.addf %232, %233 : vector<1x10xf32>
    %c0_185 = arith.constant 0 : index
    %c0_186 = arith.constant 0 : index
    %c0_187 = arith.constant 0 : index
    %235 = vector.load %arg14[%c0_185, %c0_186, %c0_187] : memref<1x1x10xf32, #tpu.memory_space<vmem>>, vector<1x1x10xf32>
    %236 = vector.shape_cast %235 : vector<1x1x10xf32> to vector<1x10xf32>
    %237 = vector.shape_cast %234 : vector<1x10xf32> to vector<1x1x10xf32>
    tpu.vector_store %arg14[%c0_185, %c0_186, %c0_187], %237 {strides = array<i32>} : memref<1x1x10xf32, #tpu.memory_space<vmem>>, vector<1x1x10xf32>,
    return
  }
  func.func @transform_0(%arg0: i32) -> (i32, i32, i32) {
    %c0_i32 = arith.constant 0 : i32
    %c0_i32_0 = arith.constant 0 : i32
    %c0_i32_1 = arith.constant 0 : i32
    return %arg0, %c0_i32, %c0_i32_0 : i32, i32, i32
  }
  func.func @transform_1(%arg0: i32) -> (i32, i32, i32) {
    %c0_i32 = arith.constant 0 : i32
    %c0_i32_0 = arith.constant 0 : i32
    %c0_i32_1 = arith.constant 0 : i32
    %c0_i32_2 = arith.constant 0 : i32
    return %c0_i32, %c0_i32_0, %c0_i32_1 : i32, i32, i32
  }
  func.func @transform_2(%arg0: i32) -> (i32, i32, i32) {
    %c0_i32 = arith.constant 0 : i32
    %c0_i32_0 = arith.constant 0 : i32
    %c0_i32_1 = arith.constant 0 : i32
    %c0_i32_2 = arith.constant 0 : i32
    return %c0_i32, %c0_i32_0, %c0_i32_1 : i32, i32, i32
  }
  func.func @transform_3(%arg0: i32) -> (i32, i32) {
    %c0_i32 = arith.constant 0 : i32
    %c0_i32_0 = arith.constant 0 : i32
    %c0_i32_1 = arith.constant 0 : i32
    return %c0_i32, %c0_i32_0 : i32, i32
  }
  func.func @transform_4(%arg0: i32) -> (i32, i32, i32) {
    %c0_i32 = arith.constant 0 : i32
    %c0_i32_0 = arith.constant 0 : i32
    %c0_i32_1 = arith.constant 0 : i32
    %c0_i32_2 = arith.constant 0 : i32
    return %c0_i32, %c0_i32_0, %c0_i32_1 : i32, i32, i32
  }
  func.func @transform_5(%arg0: i32) -> (i32, i32, i32) {
    %c0_i32 = arith.constant 0 : i32
    %c0_i32_0 = arith.constant 0 : i32
    %c0_i32_1 = arith.constant 0 : i32
    %c0_i32_2 = arith.constant 0 : i32
    return %c0_i32, %c0_i32_0, %c0_i32_1 : i32, i32, i32
  }
  func.func @transform_6(%arg0: i32) -> (i32, i32) {
    %c0_i32 = arith.constant 0 : i32
    %c0_i32_0 = arith.constant 0 : i32
    %c0_i32_1 = arith.constant 0 : i32
    return %c0_i32, %c0_i32_0 : i32, i32
  }
  func.func @transform_7(%arg0: i32) -> (i32, i32, i32) {
    %c0_i32 = arith.constant 0 : i32
    %c0_i32_0 = arith.constant 0 : i32
    %c0_i32_1 = arith.constant 0 : i32
    %c0_i32_2 = arith.constant 0 : i32
    return %c0_i32, %c0_i32_0, %c0_i32_1 : i32, i32, i32
  }
  func.func @transform_8(%arg0: i32) -> (i32, i32) {
    %c0_i32 = arith.constant 0 : i32
    %c0_i32_0 = arith.constant 0 : i32
    %c0_i32_1 = arith.constant 0 : i32
    return %c0_i32, %c0_i32_0 : i32, i32
  }
  func.func @transform_9(%arg0: i32) -> (i32, i32) {
    %c0_i32 = arith.constant 0 : i32
    %c0_i32_0 = arith.constant 0 : i32
    %c0_i32_1 = arith.constant 0 : i32
    return %c0_i32, %c0_i32_0 : i32, i32
  }
  func.func @transform_10(%arg0: i32) -> (i32, i32) {
    %c0_i32 = arith.constant 0 : i32
    %c0_i32_0 = arith.constant 0 : i32
    %c0_i32_1 = arith.constant 0 : i32
    return %c0_i32, %c0_i32_0 : i32, i32
  }
  func.func @transform_11(%arg0: i32) -> (i32, i32) {
    %c0_i32 = arith.constant 0 : i32
    %c0_i32_0 = arith.constant 0 : i32
    %c0_i32_1 = arith.constant 0 : i32
    return %c0_i32, %c0_i32_0 : i32, i32
  }
  func.func @transform_12(%arg0: i32) -> (i32, i32) {
    %c0_i32 = arith.constant 0 : i32
    %c0_i32_0 = arith.constant 0 : i32
    %c0_i32_1 = arith.constant 0 : i32
    return %c0_i32, %c0_i32_0 : i32, i32
  }
  func.func @transform_13(%arg0: i32) -> (i32, i32, i32) {
    %c0_i32 = arith.constant 0 : i32
    %c0_i32_0 = arith.constant 0 : i32
    %c0_i32_1 = arith.constant 0 : i32
    return %arg0, %c0_i32, %c0_i32_0 : i32, i32, i32
  }
}

</mosaic_0001>

<bundles_post_ra>
// kernel: net_forward.1
= control target key start
LH: loop header
LB: loop body
LE: loop exit
PB: predicated region body
PF: predicated region fallthrough
CT: control target
= control target key end

     0   :  { %18 = vsyncpa [#allocation5], 0  ;;  %s6121_s0 = inlined_call_operand.vmem [shape: f32[2,32,96], index: 0, kind: input, shape index: {}]   ;;  %s6122_s1 = inlined_call_operand.vmem [shape: f32[5,96,84], index: 1, kind: input, shape index: {}]   ;;  %s6123_s2 = inlined_call_operand.vmem [shape: f32[5,96,84], index: 2, kind: input, shape index: {}]   ;;  %s6124_s3 = inlined_call_operand.vmem [shape: f32[1,84], index: 3, kind: input, shape index: {}]   ;;  %s6125_s4 = inlined_call_operand.vmem [shape: f32[5,84,80], index: 4, kind: input, shape index: {}]   ;;  %s6126_s5 = inlined_call_operand.vmem [shape: f32[5,84,80], index: 5, kind: input, shape index: {}]   ;;  %s6127_s6 = inlined_call_operand.vmem [shape: f32[1,80], index: 6, kind: input, shape index: {}]   ;;  %s6128_s7 = inlined_call_operand.vmem [shape: f32[5,80,120], index: 7, kind: input, shape index: {}]   ;;  %s6129_s8 = inlined_call_operand.vmem [shape: f32[1,120], index: 8, kind: input, shape index: {}]   ;;  %s6130_s9 = inlined_call_operand.vmem [shape: f32[120,84], index: 9, kind: input, shape index: {}]   ;;  %s6131_s10 = inlined_call_operand.vmem [shape: f32[1,84], index: 10, kind: input, shape index: {}]   ;;  %s6132_s11 = inlined_call_operand.vmem [shape: f32[84,10], index: 11, kind: input, shape index: {}]   ;;  %s6133_s12 = inlined_call_operand.vmem [shape: f32[1,10], index: 12, kind: input, shape index: {}]   ;;  %s6134_s13 = inlined_call_operand.hbm [shape: f32[2,1,10], index: 13, kind: output, shape index: {}]  }
   0x1   :  { %20 = vsyncpa [#allocation5 + $0x1], 0  ;;  %s4834_s25 = smov 0   ;;  %s4836_s26 = smov 0  }
   0x2   :  { %s4838_s27 = smov 0   ;;  %s4840_s28 = smov 0  }
   0x3 LB: > { %6138 = sst [smem:[#allocation7_spill]] %s4755_s27  ;;  %s4855_s29 = sadd.s32 4294967295, %s4759_s28   ;;  %s4759_s28 = sphi %s4840_s28, %s6143_s28   ;;  %s4755_s27 = sphi %s4838_s27, %s6145_s27   ;;  %s4751_s26 = sphi %s4836_s26, %s6147_s26   ;;  %s4747_s25 = sphi %s4834_s25, %s6146_s25  }
   0x4   : > { %s3248_s30 = sadd.s32 4294967294, %s4759_s28   ;;  %s4859_s14 = sadd.s32 1, %s4759_s28  }
   0x5   : > { %6139 = sst [smem:[#allocation8_spill]] %s4859_s14  ;;  %s311_s15 = sadd.s32 1, %s4755_s27 }
   0x6   : > { %s308_s16 = ssub.s32 %s4759_s28, %s4859_s14  ;;  %p321_p0 = scmp.ne.s32.totalorder %s4755_s27, %s4751_s26 }
   0x7   : > { %p309_p1 = scmp.eq.s32.totalorder %s308_s16, 0  ;;  %p322_p2 = scmp.eq.s32.totalorder %s4855_s29, 1 }
   0x8   : > { %p327_p3 = scmp.ne.s32.totalorder %s4751_s26, %s4747_s25  ;;  %p328_p4 = scmp.eq.s32.totalorder %s3248_s30, 1 }
   0x9   : > { %s4870_s17 = scalar_select %p309_p1, %s4755_s27, %s311_s15  }
   0xa   : > { %p4872_p5 = por %p322_p2, %p321_p0  ;;  %p4876_p6 = por %p328_p4, %p327_p3 }
   0xb   : > { %6140 = sst [smem:[#allocation9_spill]] %s4870_s17  ;;  %p3251_p7 = scmp.ge.s32.totalorder %s4759_s28, 1 }
   0xc   : > { %p390_p8 = scmp.lt.s32.totalorder %s4759_s28, 3 }
   0xe   : > { %p391_p9 = pnand %p3251_p7, %p390_p8 }
   0xf   : > { %p433_p10 = scmp.lt.s32.totalorder (!%p391_p9), %s4855_s29, 1  ;;  %s431_s21 = sand.u32 (!%p391_p9), 1, %s4751_s26  }
  0x10   : > { %394 = sbr.rel (%p391_p9) target bundleno = 1337 (0x539), region = 72  ;;  %s3558_s14 = sshll.u32 (!%p391_p9), %s4855_s29, 4 }
  0x11   : > { %s6086_s27 = scalar_lea.hbm (!%p391_p9), %s6134_s13, %s3558_s14 }
  0x15   : > { %v3265_v0 = vld [vmem:[%s6122_s1 + $0xb8] sm:$0xff]  ;;  %v3264_v2 = vld [vmem:[%s6122_s1 + $0xb0] sm:$0xff]  ;;  %v3263_v4 = vld [vmem:[%s6122_s1 + $0xa8] sm:$0xff]  ;;  %s434_s15 = scalar_select %p433_p10, %s4855_s29, 1  ;;  %vm483_vm0 = vcmask 785408   ;;  %vm1627_vm1 = vcmask 1043456  }
  0x16   : > { %v453_v1 = vld [vmem:[%s6122_s1 + $0x58] sm:$0xff]  ;;  %3935 = vmatprep.subr.mxu0 %v3265_v0  ;;  %v452_v3 = vld [vmem:[%s6122_s1 + $0x50] sm:$0xff]  ;;  %v451_v5 = vld [vmem:[%s6122_s1 + $0x48] sm:$0xff]  ;;  %vm1556_vm2 = vcmask 684036   ;;  %vm1558_vm3 = vcmask 686086   ;;  %vm1552_vm4 = vcmask 679936  }
  0x17   : > { %3965 = vmatprep.subr.mxu1 %v453_v1  ;;  %3936 = vmatpush3.msra.mxu0 %v3265_v0  ;;  %v3262_v6 = vld [vmem:[%s6122_s1 + $0xa0] sm:$0xff]  ;;  %v3261_v8 = vld [vmem:[%s6122_s1 + $0x98] sm:$0xff]  ;;  %v3260_v10 = vld [vmem:[%s6122_s1 + $0x90] sm:$0xff]  ;;  %s3561_s17 = sshll.u32 %s434_s15, 5  ;;  %vm1554_vm5 = vcmask 681986   ;;  %vm1620_vm6 = vcmask 687104  }
  0x18   : > { %3966 = vmatpush3.msra.mxu1 %v453_v1  ;;  %3937 = vmatprep.subr.mxu0 %v3264_v2  ;;  %v450_v7 = vld [vmem:[%s6122_s1 + $0x40] sm:$0xff]  ;;  %v449_v9 = vld [vmem:[%s6122_s1 + $0x38] sm:$0xff]  ;;  %v448_v11 = vld [vmem:[%s6122_s1 + $0x30] sm:$0xff]  ;;  %s4953_s16 = scalar_lea.vmem %s6121_s0, %s3561_s17  ;;  %vm4762_vm7 = vmmov 0   ;;  %vm2555_vm8 = vcmask 647168   ;;  %vm2557_vm9 = vcmask 649218  }
  0x19   : > { %3967 = vmatprep.subr.mxu1 %v452_v3  ;;  %3938 = vmatpush3.msra.mxu0 %v3264_v2  ;;  %v3259_v12 = vld [vmem:[%s6122_s1 + $0x88] sm:$0xff]  ;;  %v3258_v14 = vld [vmem:[%s6122_s1 + $0x80] sm:$0xff]  ;;  %v3257_v16 = vld [vmem:[%s6122_s1 + $0x78] sm:$0xff]  ;;  %vm2559_vm10 = vcmask 651268   ;;  %vm2561_vm11 = vcmask 653318   ;;  %vm2591_vm12 = vcmask 654336  }
  0x1a   : > { %3968 = vmatpush3.msra.mxu1 %v452_v3  ;;  %3939 = vmatprep.subr.mxu0 %v3263_v4  ;;  %v447_v13 = vld [vmem:[%s6122_s1 + $0x28] sm:$0xff]  ;;  %v446_v15 = vld [vmem:[%s6122_s1 + $0x20] sm:$0xff]  ;;  %v445_v17 = vld [vmem:[%s6122_s1 + $0x18] sm:$0xff]  ;;  %vm3015_vm13 = vcmask 982016   ;;  %s432_s17 = scalar_lea.vmem [#allocation4], %s431_s21  ;;  %vm3178_vm14 = vcmask 73728  }
  0x1b   : > { %3969 = vmatprep.subr.mxu1 %v451_v5  ;;  %3940 = vmatpush3.msra.mxu0 %v3263_v4  ;;  %v3256_v18 = vld [vmem:[%s6122_s1 + $0x70] sm:$0xff]  ;;  %v3255_v20 = vld [vmem:[%s6122_s1 + $0x68] sm:$0xff]  ;;  %v3254_v22 = vld [vmem:[%s6122_s1 + $0x60] sm:$0xff]  ;;  %s3193_s24 = sshll.u32 %s432_s17, 4  ;;  %s4763_s29 = smov [#allocation4]   ;;  %s3194_s24 = int_to_ptr.vmem [resolvable:$true] %s3193_s24 }
  0x1c   : > { %3970 = vmatpush3.msra.mxu1 %v451_v5  ;;  %3941 = vmatprep.subr.mxu0 %v3262_v6  ;;  %v444_v19 = vld [vmem:[%s6122_s1 + $0x10] sm:$0xff]  ;;  %v443_v21 = vld [vmem:[%s6122_s1 + $0x8] sm:$0xff]  ;;  %v442_v23 = vld [vmem:[%s6122_s1] sm:$0xff]  ;;  %s4699_s20 = scalar_lea.vmem %s3194_s24, 16  ;;  %s4703_s22 = sshll.u32 %s4763_s29, 4  ;;  %s4704_s22 = int_to_ptr.vmem [resolvable:$false] %s4703_s22 }
  0x1d   : > { %3971 = vmatprep.subr.mxu1 %v450_v7  ;;  %3942 = vmatpush3.msra.mxu0 %v3262_v6  ;;  %v4962_v24 = vld [vmem:[%s4953_s16 + $0x1] sm:$0xff]  ;;  %v4968_v26 = vld [vmem:[%s4953_s16 + $0x9] sm:$0xff]  ;;  %v3285_v28 = vld [vmem:[%s6123_s2 + $0xb8] sm:$0xff]  ;;  %p4700_p11 = scmp.ne.s32.totalorder %s3194_s24, %s4699_s20  ;;  %s4705_s23 = scalar_lea.vmem %s4704_s22, 32 }
  0x1e   : > { %3972 = vmatpush3.msra.mxu1 %v450_v7  ;;  %3943 = vmatprep.subr.mxu0 %v3261_v8  ;;  %v4965_v25 = vld [vmem:[%s4953_s16] sm:$0xff]  ;;  %v4971_v27 = vld [vmem:[%s4953_s16 + $0x8] sm:$0xff]  ;;  %v465_v29 = vld [vmem:[%s6123_s2 + $0x58] sm:$0xff]  ;;  %p4706_p0 = scmp.lt.s32.totalorder %s3194_s24, %s4704_s22  ;;  %p4707_p1 = scmp.lt.s32.totalorder %s4705_s23, %s4699_s20 }
  0x1f   : > { %3973 = vmatprep.subr.mxu1 %v449_v9  ;;  %3944 = vmatpush3.msra.mxu0 %v3261_v8  ;;  %v3284_v30 = vld [vmem:[%s6123_s2 + $0xb0] sm:$0xff]  ;;  %v3283_v32 = vld [vmem:[%s6123_s2 + $0xa8] sm:$0xff]  ;;  %v3282_v34 = vld [vmem:[%s6123_s2 + $0xa0] sm:$0xff]  ;;  %p4701_p12 = pnand %p4700_p11, %p4872_p5 }
  0x20   : > { %3974 = vmatpush3.msra.mxu1 %v449_v9  ;;  %3945 = vmatprep.subr.mxu0 %v3260_v10  ;;  %v464_v31 = vld [vmem:[%s6123_s2 + $0x50] sm:$0xff]  ;;  %v463_v33 = vld [vmem:[%s6123_s2 + $0x48] sm:$0xff]  ;;  %v462_v35 = vld [vmem:[%s6123_s2 + $0x40] sm:$0xff]  ;;  %p4708_p2 = por %p4707_p1, %p4706_p0 }
  0x21   : > { %3975 = vmatprep.subr.mxu1 %v448_v11  ;;  %3946 = vmatpush3.msra.mxu0 %v3260_v10  ;;  %v3281_v36 = vld [vmem:[%s6123_s2 + $0x98] sm:$0xff]  ;;  %v3280_v38 = vld [vmem:[%s6123_s2 + $0x90] sm:$0xff]  ;;  %v3279_v40 = vld [vmem:[%s6123_s2 + $0x88] sm:$0xff]  ;;  %p4702_p13 = pneg %p4701_p12 }
  0x22   : > { %3976 = vmatpush3.msra.mxu1 %v448_v11  ;;  %3947 = vmatprep.subr.mxu0 %v3259_v12  ;;  %v461_v37 = vld [vmem:[%s6123_s2 + $0x38] sm:$0xff]  ;;  %v460_v39 = vld [vmem:[%s6123_s2 + $0x30] sm:$0xff]  ;;  %v459_v41 = vld [vmem:[%s6123_s2 + $0x28] sm:$0xff] }
  0x23   : > { %3977 = vmatprep.subr.mxu1 %v447_v13  ;;  %3948 = vmatpush3.msra.mxu0 %v3259_v12  ;;  %v3278_v42 = vld [vmem:[%s6123_s2 + $0x80] sm:$0xff]  ;;  %v3277_v44 = vld [vmem:[%s6123_s2 + $0x78] sm:$0xff]  ;;  %v5039_v47 = vld [vmem:[%s4953_s16 + $0x10] sm:$0xff]  ;;  %p4709_p3 = pnand %p4708_p2, %p4702_p13 }
  0x24   : > { %3978 = vmatpush3.msra.mxu1 %v447_v13  ;;  %3949 = vmatprep.subr.mxu0 %v3258_v14  ;;  %v458_v43 = vld [vmem:[%s6123_s2 + $0x20] sm:$0xff]  ;;  %v457_v45 = vld [vmem:[%s6123_s2 + $0x18] sm:$0xff]  ;;  %v3276_v48 = vld [vmem:[%s6123_s2 + $0x70] sm:$0xff] }
  0x25   : > { %3979 = vmatprep.subr.mxu1 %v446_v15  ;;  %3950 = vmatpush3.msra.mxu0 %v3258_v14  ;;  %v5036_v46 = vld [vmem:[%s4953_s16 + $0x11] sm:$0xff]  ;;  %v5048_v50 = vld [vmem:[%s4953_s16 + $0x19] sm:$0xf]  ;;  %v3275_v52 = vld [vmem:[%s6123_s2 + $0x68] sm:$0xff] }
  0x26   : > { %3980 = vmatpush3.msra.mxu1 %v446_v15  ;;  %3951 = vmatprep.subr.mxu0 %v3257_v16  ;;  %v456_v49 = vld [vmem:[%s6123_s2 + $0x10] sm:$0xff]  ;;  %v5051_v51 = vld [vmem:[%s4953_s16 + $0x18] sm:$0xf]  ;;  %v455_v53 = vld [vmem:[%s6123_s2 + $0x8] sm:$0xff] }
  0x27   : > { %3981 = vmatprep.subr.mxu1 %v445_v17  ;;  %3952 = vmatpush3.msra.mxu0 %v3257_v16  ;;  %v3274_v54 = vld [vmem:[%s6123_s2 + $0x60] sm:$0xff]  ;;  %v3305_v56 = vld [vmem:[%s6122_s1 + $0x118] sm:$0xff]  ;;  %v3304_v58 = vld [vmem:[%s6122_s1 + $0x110] sm:$0xff] }
  0x28   : > { %3982 = vmatpush3.msra.mxu1 %v445_v17  ;;  %3953 = vmatprep.subr.mxu0 %v3256_v18  ;;  %v454_v55 = vld [vmem:[%s6123_s2] sm:$0xff]  ;;  %v3321_v57 = vld [vmem:[%s6123_s2 + $0x118] sm:$0xff]  ;;  %v3320_v59 = vld [vmem:[%s6123_s2 + $0x110] sm:$0xff] }
  0x29   : > { %3983 = vmatprep.subr.mxu1 %v444_v19  ;;  %3954 = vmatpush3.msra.mxu0 %v3256_v18  ;;  %v3303_v60 = vld [vmem:[%s6122_s1 + $0x108] sm:$0xff]  ;;  %v3302_v62 = vld [vmem:[%s6122_s1 + $0x100] sm:$0xff]  ;;  %v3301_v0 = vld [vmem:[%s6122_s1 + $0xf8] sm:$0xff] }
  0x2a   : > { %3984 = vmatpush3.msra.mxu1 %v444_v19  ;;  %3955 = vmatprep.subr.mxu0 %v3255_v20  ;;  %v3319_v61 = vld [vmem:[%s6123_s2 + $0x108] sm:$0xff]  ;;  %v3318_v63 = vld [vmem:[%s6123_s2 + $0x100] sm:$0xff]  ;;  %v3317_v1 = vld [vmem:[%s6123_s2 + $0xf8] sm:$0xff] }
  0x2b   : > { %3985 = vmatprep.subr.mxu1 %v443_v21  ;;  %3956 = vmatpush3.msra.mxu0 %v3255_v20  ;;  %v3300_v2 = vld [vmem:[%s6122_s1 + $0xf0] sm:$0xff]  ;;  %v3299_v4 = vld [vmem:[%s6122_s1 + $0xe8] sm:$0xff]  ;;  %v3298_v6 = vld [vmem:[%s6122_s1 + $0xe0] sm:$0xff] }
  0x2c   : > { %3986 = vmatpush3.msra.mxu1 %v443_v21  ;;  %3957 = vmatprep.subr.mxu0 %v3254_v22  ;;  %v3316_v3 = vld [vmem:[%s6123_s2 + $0xf0] sm:$0xff]  ;;  %v3315_v5 = vld [vmem:[%s6123_s2 + $0xe8] sm:$0xff]  ;;  %v3314_v7 = vld [vmem:[%s6123_s2 + $0xe0] sm:$0xff] }
  0x2d   : > { %3987 = vmatprep.subr.mxu1 %v442_v23  ;;  %3958 = vmatpush3.msra.mxu0 %v3254_v22  ;;  %v3297_v8 = vld [vmem:[%s6122_s1 + $0xd8] sm:$0xff]  ;;  %v3296_v10 = vld [vmem:[%s6122_s1 + $0xd0] sm:$0xff]  ;;  %v3295_v12 = vld [vmem:[%s6122_s1 + $0xc8] sm:$0xff] }
  0x2e   : > { %3959 = vmatprep.mubr.msk.f32.mxu0 %vm483_vm0, %v4962_v24  ;;  %3988 = vmatpush3.msra.mxu1 %v442_v23  ;;  %v3313_v9 = vld [vmem:[%s6123_s2 + $0xd8] sm:$0xff]  ;;  %v3312_v11 = vld [vmem:[%s6123_s2 + $0xd0] sm:$0xff]  ;;  %v3311_v13 = vld [vmem:[%s6123_s2 + $0xc8] sm:$0xff] }
  0x2f   : > { %3989 = vmatprep.mubr.msk.f32.mxu1 %vm483_vm0, %v4965_v25  ;;  %3960 = vmatmul.mubr.msk.f32.vlgmr.msra.gmra.mxu0 %vm483_vm0, %v4968_v26  ;;  %v3294_v14 = vld [vmem:[%s6122_s1 + $0xc0] sm:$0xff]  ;;  %v862_v17 = vld [vmem:[%s4953_s16 + $0xa] sm:$0xff]  ;;  %v3337_v18 = vld [vmem:[%s6122_s1 + $0x178] sm:$0xff] }
  0x30   : > { %3990 = vmatmul.mubr.msk.f32.vlgmr.msra.gmra.mxu1 %vm483_vm0, %v4971_v27  ;;  %3995 = vmatprep.subr.mxu0 %v3285_v28  ;;  %v3310_v15 = vld [vmem:[%s6123_s2 + $0xc0] sm:$0xff]  ;;  %v3353_v19 = vld [vmem:[%s6123_s2 + $0x178] sm:$0xff]  ;;  %v3336_v20 = vld [vmem:[%s6122_s1 + $0x170] sm:$0xff] }
  0x31   : > { %4025 = vmatprep.subr.mxu1 %v465_v29  ;;  %3996 = vmatpush3.msra.mxu0 %v3285_v28  ;;  %v861_v16 = vld [vmem:[%s4953_s16 + $0x2] sm:$0xff]  ;;  %v3352_v21 = vld [vmem:[%s6123_s2 + $0x170] sm:$0xff]  ;;  %v864_v23 = vld [vmem:[%s4953_s16 + $0x1a] sm:$0xf] }
  0x32   : > { %4026 = vmatpush3.msra.mxu1 %v465_v29  ;;  %3997 = vmatprep.subr.mxu0 %v3284_v30  ;;  %v863_v22 = vld [vmem:[%s4953_s16 + $0x12] sm:$0xff] }
  0x33   : > { %4027 = vmatprep.subr.mxu1 %v464_v31  ;;  %3998 = vmatpush3.msra.mxu0 %v3284_v30  ;;  %v3333_v28 = vld [vmem:[%s6122_s1 + $0x158] sm:$0xff]  ;;  %v3332_v30 = vld [vmem:[%s6122_s1 + $0x150] sm:$0xff] }
  0x34   : > { %4028 = vmatpush3.msra.mxu1 %v464_v31  ;;  %3999 = vmatprep.subr.mxu0 %v3283_v32  ;;  %v3349_v29 = vld [vmem:[%s6123_s2 + $0x158] sm:$0xff]  ;;  %v3348_v31 = vld [vmem:[%s6123_s2 + $0x150] sm:$0xff] }
  0x35   : > { %4029 = vmatprep.subr.mxu1 %v463_v33  ;;  %4000 = vmatpush3.msra.mxu0 %v3283_v32  ;;  %v3331_v32 = vld [vmem:[%s6122_s1 + $0x148] sm:$0xff] }
  0x36   : > { %4030 = vmatpush3.msra.mxu1 %v463_v33  ;;  %4001 = vmatprep.subr.mxu0 %v3282_v34  ;;  %v3347_v33 = vld [vmem:[%s6123_s2 + $0x148] sm:$0xff] }
  0x37   : > { %4031 = vmatprep.subr.mxu1 %v462_v35  ;;  %4002 = vmatpush3.msra.mxu0 %v3282_v34  ;;  %v3330_v34 = vld [vmem:[%s6122_s1 + $0x140] sm:$0xff] }
  0x38   : > { %4032 = vmatpush3.msra.mxu1 %v462_v35  ;;  %4003 = vmatprep.subr.mxu0 %v3281_v36  ;;  %v3346_v35 = vld [vmem:[%s6123_s2 + $0x140] sm:$0xff] }
  0x39   : > { %4033 = vmatprep.subr.mxu1 %v461_v37  ;;  %4004 = vmatpush3.msra.mxu0 %v3281_v36  ;;  %v3329_v36 = vld [vmem:[%s6122_s1 + $0x138] sm:$0xff] }
  0x3a   : > { %4034 = vmatpush3.msra.mxu1 %v461_v37  ;;  %4005 = vmatprep.subr.mxu0 %v3280_v38  ;;  %v3345_v37 = vld [vmem:[%s6123_s2 + $0x138] sm:$0xff] }
  0x3b   : > { %4035 = vmatprep.subr.mxu1 %v460_v39  ;;  %4006 = vmatpush3.msra.mxu0 %v3280_v38  ;;  %v3328_v38 = vld [vmem:[%s6122_s1 + $0x130] sm:$0xff] }
  0x3c   : > { %4036 = vmatpush3.msra.mxu1 %v460_v39  ;;  %4007 = vmatprep.subr.mxu0 %v3279_v40  ;;  %v3344_v39 = vld [vmem:[%s6123_s2 + $0x130] sm:$0xff] }
  0x3d   : > { %4037 = vmatprep.subr.mxu1 %v459_v41  ;;  %4008 = vmatpush3.msra.mxu0 %v3279_v40  ;;  %v3327_v40 = vld [vmem:[%s6122_s1 + $0x128] sm:$0xff] }
  0x3e   : > { %4038 = vmatpush3.msra.mxu1 %v459_v41  ;;  %4009 = vmatprep.subr.mxu0 %v3278_v42  ;;  %v3343_v41 = vld [vmem:[%s6123_s2 + $0x128] sm:$0xff] }
  0x3f   : > { %4039 = vmatprep.subr.mxu1 %v458_v43  ;;  %4010 = vmatpush3.msra.mxu0 %v3278_v42  ;;  %v3326_v42 = vld [vmem:[%s6122_s1 + $0x120] sm:$0xff] }
  0x40   : > { %4040 = vmatpush3.msra.mxu1 %v458_v43  ;;  %4011 = vmatprep.subr.mxu0 %v3277_v44  ;;  %v3342_v43 = vld [vmem:[%s6123_s2 + $0x120] sm:$0xff] }
  0x41   : > { %4041 = vmatprep.subr.mxu1 %v457_v45  ;;  %4012 = vmatpush3.msra.mxu0 %v3277_v44  ;;  %v1081_v44 = vld [vmem:[%s4953_s16 + $0x3] sm:$0xff] }
  0x42   : > { %4042 = vmatpush3.msra.mxu1 %v457_v45  ;;  %3962 = vmatprep.mubr.msk.f32.mxu0 %vm483_vm0, %v5036_v46  ;;  %v1082_v45 = vld [vmem:[%s4953_s16 + $0xb] sm:$0xff] }
  0x43   : > { %3992 = vmatprep.mubr.msk.f32.mxu1 %vm483_vm0, %v5039_v47  ;;  %4013 = vmatprep.subr.mxu0 %v3276_v48 }
  0x44   : > { %4043 = vmatprep.subr.mxu1 %v456_v49  ;;  %3963 = vmatmul.mubr.msk.f32.gmra.mxu0 %vm483_vm0, %v5048_v50 }
  0x45   : > { %3993 = vmatmul.mubr.msk.f32.gmra.mxu1 %vm483_vm0, %v5051_v51  ;;  %4014 = vmatpush3.msra.mxu0 %v3276_v48  ;;  %v3368_v48 = vld [vmem:[%s6122_s1 + $0x1d0] sm:$0xff] }
  0x46   : > { %4044 = vmatpush3.msra.mxu1 %v456_v49  ;;  %4015 = vmatprep.subr.mxu0 %v3275_v52  ;;  %v3384_v49 = vld [vmem:[%s6123_s2 + $0x1d0] sm:$0xff] }
  0x47   : > { %4045 = vmatprep.subr.mxu1 %v455_v53  ;;  %4016 = vmatpush3.msra.mxu0 %v3275_v52  ;;  %v3367_v52 = vld [vmem:[%s6122_s1 + $0x1c8] sm:$0xff] }
  0x48   : > { %4046 = vmatpush3.msra.mxu1 %v455_v53  ;;  %4017 = vmatprep.subr.mxu0 %v3274_v54  ;;  %v3383_v53 = vld [vmem:[%s6123_s2 + $0x1c8] sm:$0xff] }
  0x49   : > { %4047 = vmatprep.subr.mxu1 %v454_v55  ;;  %4018 = vmatpush3.msra.mxu0 %v3274_v54  ;;  %v3366_v54 = vld [vmem:[%s6122_s1 + $0x1c0] sm:$0xff] }
  0x4a   : > { %4019 = vmatprep.mubr.msk.f32.mxu0 %vm483_vm0, %v4962_v24  ;;  %4048 = vmatpush3.msra.mxu1 %v454_v55  ;;  %v3335_v24 = vld [vmem:[%s6122_s1 + $0x168] sm:$0xff]  ;;  %v3382_v55 = vld [vmem:[%s6123_s2 + $0x1c0] sm:$0xff] }
  0x4b   : > { %4049 = vmatprep.mubr.msk.f32.mxu1 %vm483_vm0, %v4965_v25  ;;  %4020 = vmatmul.mubr.msk.f32.vlgmr.msra.gmra.mxu0 %vm483_vm0, %v4968_v26  ;;  %v3351_v25 = vld [vmem:[%s6123_s2 + $0x168] sm:$0xff]  ;;  %v3334_v26 = vld [vmem:[%s6122_s1 + $0x160] sm:$0xff] }
  0x4c   : > { %4050 = vmatmul.mubr.msk.f32.vlgmr.msra.gmra.mxu1 %vm483_vm0, %v4971_v27  ;;  %4055 = vmatprep.subr.mxu0 %v3305_v56  ;;  %v3350_v27 = vld [vmem:[%s6123_s2 + $0x160] sm:$0xff] }
  0x4d   : > { %4085 = vmatprep.subr.mxu1 %v3321_v57  ;;  %4056 = vmatpush3.msra.mxu0 %v3305_v56  ;;  %v3365_v56 = vld [vmem:[%s6122_s1 + $0x1b8] sm:$0xff] }
  0x4e   : > { %4086 = vmatpush3.msra.mxu1 %v3321_v57  ;;  %4057 = vmatprep.subr.mxu0 %v3304_v58  ;;  %v3381_v57 = vld [vmem:[%s6123_s2 + $0x1b8] sm:$0xff] }
  0x4f   : > { %4087 = vmatprep.subr.mxu1 %v3320_v59  ;;  %4058 = vmatpush3.msra.mxu0 %v3304_v58  ;;  %v3364_v58 = vld [vmem:[%s6122_s1 + $0x1b0] sm:$0xff] }
  0x50   : > { %4088 = vmatpush3.msra.mxu1 %v3320_v59  ;;  %4059 = vmatprep.subr.mxu0 %v3303_v60  ;;  %v3380_v59 = vld [vmem:[%s6123_s2 + $0x1b0] sm:$0xff] }
  0x51   : > { %4089 = vmatprep.subr.mxu1 %v3319_v61  ;;  %4060 = vmatpush3.msra.mxu0 %v3303_v60  ;;  %v3363_v60 = vld [vmem:[%s6122_s1 + $0x1a8] sm:$0xff] }
  0x52   : > { %4090 = vmatpush3.msra.mxu1 %v3319_v61  ;;  %4061 = vmatprep.subr.mxu0 %v3302_v62  ;;  %v3379_v61 = vld [vmem:[%s6123_s2 + $0x1a8] sm:$0xff] }
  0x53   : > { %4091 = vmatprep.subr.mxu1 %v3318_v63  ;;  %4062 = vmatpush3.msra.mxu0 %v3302_v62  ;;  %v3362_v62 = vld [vmem:[%s6122_s1 + $0x1a0] sm:$0xff] }
  0x54   : > { %4092 = vmatpush3.msra.mxu1 %v3318_v63  ;;  %4063 = vmatprep.subr.mxu0 %v3301_v0  ;;  %v3378_v63 = vld [vmem:[%s6123_s2 + $0x1a0] sm:$0xff] }
  0x55   : > { %4093 = vmatprep.subr.mxu1 %v3317_v1  ;;  %4064 = vmatpush3.msra.mxu0 %v3301_v0  ;;  %v3361_v0 = vld [vmem:[%s6122_s1 + $0x198] sm:$0xff] }
  0x56   : > { %4094 = vmatpush3.msra.mxu1 %v3317_v1  ;;  %4065 = vmatprep.subr.mxu0 %v3300_v2  ;;  %v3377_v1 = vld [vmem:[%s6123_s2 + $0x198] sm:$0xff] }
  0x57   : > { %4095 = vmatprep.subr.mxu1 %v3316_v3  ;;  %4066 = vmatpush3.msra.mxu0 %v3300_v2  ;;  %v3360_v2 = vld [vmem:[%s6122_s1 + $0x190] sm:$0xff] }
  0x58   : > { %4096 = vmatpush3.msra.mxu1 %v3316_v3  ;;  %4067 = vmatprep.subr.mxu0 %v3299_v4  ;;  %v3376_v3 = vld [vmem:[%s6123_s2 + $0x190] sm:$0xff] }
  0x59   : > { %4097 = vmatprep.subr.mxu1 %v3315_v5  ;;  %4068 = vmatpush3.msra.mxu0 %v3299_v4  ;;  %v3359_v4 = vld [vmem:[%s6122_s1 + $0x188] sm:$0xff] }
  0x5a   : > { %4098 = vmatpush3.msra.mxu1 %v3315_v5  ;;  %4069 = vmatprep.subr.mxu0 %v3298_v6  ;;  %v3375_v5 = vld [vmem:[%s6123_s2 + $0x188] sm:$0xff] }
  0x5b   : > { %4099 = vmatprep.subr.mxu1 %v3314_v7  ;;  %4070 = vmatpush3.msra.mxu0 %v3298_v6  ;;  %v3358_v6 = vld [vmem:[%s6122_s1 + $0x180] sm:$0xff] }
  0x5c   : > { %4100 = vmatpush3.msra.mxu1 %v3314_v7  ;;  %4071 = vmatprep.subr.mxu0 %v3297_v8  ;;  %v3374_v7 = vld [vmem:[%s6123_s2 + $0x180] sm:$0xff] }
  0x5d   : > { %4101 = vmatprep.subr.mxu1 %v3313_v9  ;;  %4072 = vmatpush3.msra.mxu0 %v3297_v8  ;;  %v1301_v8 = vld [vmem:[%s4953_s16 + $0x4] sm:$0xff] }
  0x5e   : > { %4102 = vmatpush3.msra.mxu1 %v3313_v9  ;;  %4022 = vmatprep.mubr.msk.f32.mxu0 %vm483_vm0, %v5036_v46  ;;  %v3369_v46 = vld [vmem:[%s6122_s1 + $0x1d8] sm:$0xff]  ;;  %v1302_v9 = vld [vmem:[%s4953_s16 + $0xc] sm:$0xff] }
  0x5f   : > { %4052 = vmatprep.mubr.msk.f32.mxu1 %vm483_vm0, %v5039_v47  ;;  %4073 = vmatprep.subr.mxu0 %v3296_v10  ;;  %v3385_v47 = vld [vmem:[%s6123_s2 + $0x1d8] sm:$0xff] }
  0x60   : > { %4103 = vmatprep.subr.mxu1 %v3312_v11  ;;  %4023 = vmatmul.mubr.msk.f32.gmra.mxu0 %vm483_vm0, %v5048_v50  ;;  %v1083_v50 = vld [vmem:[%s4953_s16 + $0x13] sm:$0xff] }
  0x61   : > { %4053 = vmatmul.mubr.msk.f32.gmra.mxu1 %vm483_vm0, %v5051_v51  ;;  %4074 = vmatpush3.msra.mxu0 %v3296_v10  ;;  %v1084_v51 = vld [vmem:[%s4953_s16 + $0x1b] sm:$0xf] }
  0x62   : > { %4104 = vmatpush3.msra.mxu1 %v3312_v11  ;;  %4075 = vmatprep.subr.mxu0 %v3295_v12  ;;  %v1303_v10 = vld [vmem:[%s4953_s16 + $0x14] sm:$0xff]  ;;  %v1304_v11 = vld [vmem:[%s4953_s16 + $0x1c] sm:$0xf]  ;;  %s3181_s16 = scalar_lea.sflag [#allocation5], %s431_s21 }
  0x63   : > { %4105 = vmatprep.subr.mxu1 %v3311_v13  ;;  %4076 = vmatpush3.msra.mxu0 %v3295_v12  ;;  %v1594_v12 = vld [vmem:[%s6125_s4 + $0x50] sm:$0xf] }
  0x64   : > { %4106 = vmatpush3.msra.mxu1 %v3311_v13  ;;  %4077 = vmatprep.subr.mxu0 %v3294_v14  ;;  %v3401_v13 = vld [vmem:[%s6125_s4 + $0xa8] sm:$0xf] }
  0x65   : > { %4107 = vmatprep.subr.mxu1 %v3310_v15  ;;  %4078 = vmatpush3.msra.mxu0 %v3294_v14  ;;  %v1593_v14 = vld [vmem:[%s6125_s4 + $0x48] sm:$0xff] }
  0x66   : > { %4079 = vmatprep.mubr.msk.f32.mxu0 %vm483_vm0, %v861_v16  ;;  %4108 = vmatpush3.msra.mxu1 %v3310_v15  ;;  %v3400_v15 = vld [vmem:[%s6125_s4 + $0xa0] sm:$0xff] }
  0x67   : > { %4109 = vmatprep.mubr.msk.f32.mxu1 %vm483_vm0, %v861_v16  ;;  %4080 = vmatmul.mubr.msk.f32.vlgmr.msra.gmra.mxu0 %vm483_vm0, %v862_v17  ;;  %v1592_v16 = vld [vmem:[%s6125_s4 + $0x40] sm:$0xff] }
  0x68   : > { %4110 = vmatmul.mubr.msk.f32.vlgmr.msra.gmra.mxu1 %vm483_vm0, %v862_v17  ;;  %4115 = vmatprep.subr.mxu0 %v3337_v18  ;;  %v3399_v17 = vld [vmem:[%s6125_s4 + $0x98] sm:$0xff] }
  0x69   : > { %4145 = vmatprep.subr.mxu1 %v3353_v19  ;;  %4116 = vmatpush3.msra.mxu0 %v3337_v18  ;;  %v1591_v18 = vld [vmem:[%s6125_s4 + $0x38] sm:$0xff] }
  0x6a   : > { %4146 = vmatpush3.msra.mxu1 %v3353_v19  ;;  %4117 = vmatprep.subr.mxu0 %v3336_v20  ;;  %v3398_v19 = vld [vmem:[%s6125_s4 + $0x90] sm:$0xff] }
  0x6b   : > { %4147 = vmatprep.subr.mxu1 %v3352_v21  ;;  %4082 = vmatprep.mubr.msk.f32.mxu0 %vm483_vm0, %v863_v22 }
  0x6c   : > { %4112 = vmatprep.mubr.msk.f32.mxu1 %vm483_vm0, %v863_v22  ;;  %4118 = vmatpush3.msra.mxu0 %v3336_v20  ;;  %v1590_v20 = vld [vmem:[%s6125_s4 + $0x30] sm:$0xff]  ;;  %v1589_v22 = vld [vmem:[%s6125_s4 + $0x28] sm:$0xff] }
  0x6d   : > { %4148 = vmatpush3.msra.mxu1 %v3352_v21  ;;  %4083 = vmatmul.mubr.msk.f32.gmra.mxu0 %vm483_vm0, %v864_v23  ;;  %v3397_v21 = vld [vmem:[%s6125_s4 + $0x88] sm:$0xff] }
  0x6e   : > { %4113 = vmatmul.mubr.msk.f32.gmra.mxu1 %vm483_vm0, %v864_v23  ;;  %4119 = vmatprep.subr.mxu0 %v3335_v24  ;;  %v3396_v23 = vld [vmem:[%s6125_s4 + $0x80] sm:$0xff] }
  0x6f   : > { %4149 = vmatprep.subr.mxu1 %v3351_v25  ;;  %4120 = vmatpush3.msra.mxu0 %v3335_v24  ;;  %v1588_v24 = vld [vmem:[%s6125_s4 + $0x20] sm:$0xff] }
  0x70   : > { %4150 = vmatpush3.msra.mxu1 %v3351_v25  ;;  %4121 = vmatprep.subr.mxu0 %v3334_v26  ;;  %v3395_v25 = vld [vmem:[%s6125_s4 + $0x78] sm:$0xff] }
  0x71   : > { %4151 = vmatprep.subr.mxu1 %v3350_v27  ;;  %4122 = vmatpush3.msra.mxu0 %v3334_v26  ;;  %v1587_v26 = vld [vmem:[%s6125_s4 + $0x18] sm:$0xff] }
  0x72   : > { %4152 = vmatpush3.msra.mxu1 %v3350_v27  ;;  %4123 = vmatprep.subr.mxu0 %v3333_v28  ;;  %v3394_v27 = vld [vmem:[%s6125_s4 + $0x70] sm:$0xff] }
  0x73   : > { %4153 = vmatprep.subr.mxu1 %v3349_v29  ;;  %4124 = vmatpush3.msra.mxu0 %v3333_v28  ;;  %v1586_v28 = vld [vmem:[%s6125_s4 + $0x10] sm:$0xff] }
  0x74   : > { %4154 = vmatpush3.msra.mxu1 %v3349_v29  ;;  %4125 = vmatprep.subr.mxu0 %v3332_v30  ;;  %v3393_v29 = vld [vmem:[%s6125_s4 + $0x68] sm:$0xff] }
  0x75   : > { %4155 = vmatprep.subr.mxu1 %v3348_v31  ;;  %4126 = vmatpush3.msra.mxu0 %v3332_v30  ;;  %v1585_v30 = vld [vmem:[%s6125_s4 + $0x8] sm:$0xff] }
  0x76   : > { %4156 = vmatpush3.msra.mxu1 %v3348_v31  ;;  %4127 = vmatprep.subr.mxu0 %v3331_v32  ;;  %v3392_v31 = vld [vmem:[%s6125_s4 + $0x60] sm:$0xff] }
  0x77   : > { %4157 = vmatprep.subr.mxu1 %v3347_v33  ;;  %4128 = vmatpush3.msra.mxu0 %v3331_v32  ;;  %v1584_v32 = vld [vmem:[%s6125_s4] sm:$0xff] }
  0x78   : > { %4158 = vmatpush3.msra.mxu1 %v3347_v33  ;;  %4129 = vmatprep.subr.mxu0 %v3330_v34  ;;  %v3391_v33 = vld [vmem:[%s6125_s4 + $0x58] sm:$0xff] }
  0x79   : > { %4159 = vmatprep.subr.mxu1 %v3346_v35  ;;  %4130 = vmatpush3.msra.mxu0 %v3330_v34  ;;  %v5414_v34 = vld [vmem:[%s6126_s5 + $0x50] sm:$0xf] }
  0x7a   : > { %4160 = vmatpush3.msra.mxu1 %v3346_v35  ;;  %4131 = vmatprep.subr.mxu0 %v3329_v36  ;;  %v5421_v35 = vld [vmem:[%s6126_s5 + $0xa8] sm:$0xf] }
  0x7b   : > { %4161 = vmatprep.subr.mxu1 %v3345_v37  ;;  %4132 = vmatpush3.msra.mxu0 %v3329_v36 }
  0x7c   : > { %4162 = vmatpush3.msra.mxu1 %v3345_v37  ;;  %4133 = vmatprep.subr.mxu0 %v3328_v38 }
  0x7d   : > { %4163 = vmatprep.subr.mxu1 %v3344_v39  ;;  %4134 = vmatpush3.msra.mxu0 %v3328_v38 }
  0x7e   : > { %4164 = vmatpush3.msra.mxu1 %v3344_v39  ;;  %4135 = vmatprep.subr.mxu0 %v3327_v40 }
  0x7f   : > { %4165 = vmatprep.subr.mxu1 %v3343_v41  ;;  %4136 = vmatpush3.msra.mxu0 %v3327_v40 }
  0x80   : > { %4166 = vmatpush3.msra.mxu1 %v3343_v41  ;;  %4137 = vmatprep.subr.mxu0 %v3326_v42 }
  0x81   : > { %4167 = vmatprep.subr.mxu1 %v3342_v43  ;;  %4138 = vmatpush3.msra.mxu0 %v3326_v42 }
  0x82   : > { %4139 = vmatprep.mubr.msk.f32.mxu0 %vm483_vm0, %v1081_v44  ;;  %4168 = vmatpush3.msra.mxu1 %v3342_v43 }
  0x83   : > { %4169 = vmatprep.mubr.msk.f32.mxu1 %vm483_vm0, %v1081_v44  ;;  %4140 = vmatmul.mubr.msk.f32.vlgmr.msra.gmra.mxu0 %vm483_vm0, %v1082_v45 }
  0x84   : > { %4170 = vmatmul.mubr.msk.f32.vlgmr.msra.gmra.mxu1 %vm483_vm0, %v1082_v45  ;;  %4175 = vmatprep.subr.mxu0 %v3369_v46 }
  0x85   : > { %4205 = vmatprep.subr.mxu1 %v3385_v47  ;;  %4176 = vmatpush3.msra.mxu0 %v3369_v46 }
  0x86   : > { %4206 = vmatpush3.msra.mxu1 %v3385_v47  ;;  %4177 = vmatprep.subr.mxu0 %v3368_v48 }
  0x87   : > { %4207 = vmatprep.subr.mxu1 %v3384_v49  ;;  %4142 = vmatprep.mubr.msk.f32.mxu0 %vm483_vm0, %v1083_v50 }
  0x88   : > { %4172 = vmatprep.mubr.msk.f32.mxu1 %vm483_vm0, %v1083_v50  ;;  %4178 = vmatpush3.msra.mxu0 %v3368_v48 }
  0x89   : > { %4208 = vmatpush3.msra.mxu1 %v3384_v49  ;;  %4143 = vmatmul.mubr.msk.f32.gmra.mxu0 %vm483_vm0, %v1084_v51 }
  0x8a   : > { %4173 = vmatmul.mubr.msk.f32.gmra.mxu1 %vm483_vm0, %v1084_v51  ;;  %4179 = vmatprep.subr.mxu0 %v3367_v52 }
  0x8b   : > { %4209 = vmatprep.subr.mxu1 %v3383_v53  ;;  %4180 = vmatpush3.msra.mxu0 %v3367_v52 }
  0x8c   : > { %4210 = vmatpush3.msra.mxu1 %v3383_v53  ;;  %4181 = vmatprep.subr.mxu0 %v3366_v54 }
  0x8d   : > { %4211 = vmatprep.subr.mxu1 %v3382_v55  ;;  %4182 = vmatpush3.msra.mxu0 %v3366_v54 }
  0x8e   : > { %4212 = vmatpush3.msra.mxu1 %v3382_v55  ;;  %4183 = vmatprep.subr.mxu0 %v3365_v56 }
  0x8f   : > { %4213 = vmatprep.subr.mxu1 %v3381_v57  ;;  %4184 = vmatpush3.msra.mxu0 %v3365_v56 }
  0x90   : > { %4214 = vmatpush3.msra.mxu1 %v3381_v57  ;;  %4185 = vmatprep.subr.mxu0 %v3364_v58 }
  0x91   : > { %4215 = vmatprep.subr.mxu1 %v3380_v59  ;;  %4186 = vmatpush3.msra.mxu0 %v3364_v58 }
  0x92   : > { %4216 = vmatpush3.msra.mxu1 %v3380_v59  ;;  %4187 = vmatprep.subr.mxu0 %v3363_v60 }
  0x93   : > { %4217 = vmatprep.subr.mxu1 %v3379_v61  ;;  %4188 = vmatpush3.msra.mxu0 %v3363_v60 }
  0x94   : > { %4218 = vmatpush3.msra.mxu1 %v3379_v61  ;;  %4189 = vmatprep.subr.mxu0 %v3362_v62 }
  0x95   : > { %4219 = vmatprep.subr.mxu1 %v3378_v63  ;;  %4190 = vmatpush3.msra.mxu0 %v3362_v62 }
  0x96   : > { %4220 = vmatpush3.msra.mxu1 %v3378_v63  ;;  %4191 = vmatprep.subr.mxu0 %v3361_v0 }
  0x97   : > { %4221 = vmatprep.subr.mxu1 %v3377_v1  ;;  %4192 = vmatpush3.msra.mxu0 %v3361_v0 }
  0x98   : > { %4222 = vmatpush3.msra.mxu1 %v3377_v1  ;;  %4193 = vmatprep.subr.mxu0 %v3360_v2 }
  0x99   : > { %4223 = vmatprep.subr.mxu1 %v3376_v3  ;;  %4194 = vmatpush3.msra.mxu0 %v3360_v2 }
  0x9a   : > { %4224 = vmatpush3.msra.mxu1 %v3376_v3  ;;  %4195 = vmatprep.subr.mxu0 %v3359_v4 }
  0x9b   : > { %4225 = vmatprep.subr.mxu1 %v3375_v5  ;;  %4196 = vmatpush3.msra.mxu0 %v3359_v4 }
  0x9c   : > { %4226 = vmatpush3.msra.mxu1 %v3375_v5  ;;  %4197 = vmatprep.subr.mxu0 %v3358_v6 }
  0x9d   : > { %4227 = vmatprep.subr.mxu1 %v3374_v7  ;;  %4198 = vmatpush3.msra.mxu0 %v3358_v6 }
  0x9e   : > { %4199 = vmatprep.mubr.msk.f32.mxu0 %vm483_vm0, %v1301_v8  ;;  %4228 = vmatpush3.msra.mxu1 %v3374_v7 }
  0x9f   : > { %4229 = vmatprep.mubr.msk.f32.mxu1 %vm483_vm0, %v1301_v8  ;;  %4200 = vmatmul.mubr.msk.f32.vlgmr.msra.gmra.mxu0 %vm483_vm0, %v1302_v9 }
  0xa0   : > { %4230 = vmatmul.mubr.msk.f32.vlgmr.msra.gmra.mxu1 %vm483_vm0, %v1302_v9  ;;  %4202 = vmatprep.mubr.msk.f32.mxu0 %vm483_vm0, %v1303_v10 }
  0xa1   : > { %4232 = vmatprep.mubr.msk.f32.mxu1 %vm483_vm0, %v1303_v10  ;;  %4260 = vmatprep.subr.msk.mxu1 %vm1627_vm1, %v1594_v12 }
  0xa2   : > { %4235 = vmatprep.subr.msk.mxu0 %vm1627_vm1, %v3401_v13  ;;  %4261 = vmatpush3.msk.msra.mxu1 %vm1627_vm1, %v1594_v12 }
  0xa3   : > { %4203 = vmatmul.mubr.msk.f32.gmra.mxu0 %vm483_vm0, %v1304_v11  ;;  %4262 = vmatprep.subr.mxu1 %v1593_v14 }
  0xa4   : > { %4233 = vmatmul.mubr.msk.f32.gmra.mxu1 %vm483_vm0, %v1304_v11  ;;  %4236 = vmatpush3.msk.msra.mxu0 %vm1627_vm1, %v3401_v13 }
  0xa5   : > { %4237 = vmatprep.subr.mxu0 %v3400_v15  ;;  %4263 = vmatpush3.msra.mxu1 %v1593_v14 }
  0xa6   : > { %4238 = vmatpush3.msra.mxu0 %v3400_v15  ;;  %4264 = vmatprep.subr.mxu1 %v1592_v16 }
  0xa7   : > { %4239 = vmatprep.subr.mxu0 %v3399_v17  ;;  %4265 = vmatpush3.msra.mxu1 %v1592_v16 }
  0xa8   : > { %4240 = vmatpush3.msra.mxu0 %v3399_v17  ;;  %4266 = vmatprep.subr.mxu1 %v1591_v18 }
  0xa9   : > { %4241 = vmatprep.subr.mxu0 %v3398_v19  ;;  %4267 = vmatpush3.msra.mxu1 %v1591_v18  ;;  %v3390_v18 = vld [vmem:[%s6124_s3] ss:$0 sm:$0xff] }
  0xaa   : > { %4242 = vmatpush3.msra.mxu0 %v3398_v19  ;;  %4268 = vmatprep.subr.mxu1 %v1590_v20 }
  0xab   : > { %4243 = vmatprep.subr.mxu0 %v3397_v21  ;;  %4269 = vmatpush3.msra.mxu1 %v1590_v20 }
  0xac   : > { %4244 = vmatpush3.msra.mxu0 %v3397_v21  ;;  %4270 = vmatprep.subr.mxu1 %v1589_v22 }
  0xad   : > { %4245 = vmatprep.subr.mxu0 %v3396_v23  ;;  %4271 = vmatpush3.msra.mxu1 %v1589_v22 }
  0xae   : > { %4246 = vmatpush3.msra.mxu0 %v3396_v23  ;;  %4272 = vmatprep.subr.mxu1 %v1588_v24 }
  0xaf   : > { %4247 = vmatprep.subr.mxu0 %v3395_v25  ;;  %4273 = vmatpush3.msra.mxu1 %v1588_v24 }
  0xb0   : > { %4248 = vmatpush3.msra.mxu0 %v3395_v25  ;;  %4274 = vmatprep.subr.mxu1 %v1587_v26 }
  0xb1   : > { %4249 = vmatprep.subr.mxu0 %v3394_v27  ;;  %4275 = vmatpush3.msra.mxu1 %v1587_v26 }
  0xb2   : > { %4250 = vmatpush3.msra.mxu0 %v3394_v27  ;;  %4276 = vmatprep.subr.mxu1 %v1586_v28 }
  0xb3   : > { %4251 = vmatprep.subr.mxu0 %v3393_v29  ;;  %4277 = vmatpush3.msra.mxu1 %v1586_v28 }
  0xb4   : > { %4252 = vmatpush3.msra.mxu0 %v3393_v29  ;;  %4278 = vmatprep.subr.mxu1 %v1585_v30 }
  0xb5   : > { %4253 = vmatprep.subr.mxu0 %v3392_v31  ;;  %4279 = vmatpush3.msra.mxu1 %v1585_v30 }
  0xb6   : > { %4254 = vmatpush3.msra.mxu0 %v3392_v31  ;;  %4280 = vmatprep.subr.mxu1 %v1584_v32 }
  0xb7   : > { %4255 = vmatprep.subr.mxu0 %v3391_v33  ;;  %4281 = vmatpush3.msra.mxu1 %v1584_v32 }
  0xb8   : > { %4256 = vmatpush3.msra.mxu0 %v3391_v33  ;;  %4310 = vmatprep.subr.msk.mxu1 %vm1627_vm1, %v5414_v34 }
  0xb9   : > { %4285 = vmatprep.subr.msk.mxu0 %vm1627_vm1, %v5421_v35 }
  0xef   : > { %v3961_v36 = vpop.f32.mrf.mxu0 }
  0xf0   : > { %v3991_v37 = vpop.f32.mrf.mxu1 }
  0xf1   : > { %v562_v38 = vpop.f32.mrf.mxu0  ;;  %v665_v2 = vadd.f32 %v3991_v37, %v3961_v36 }
  0xf2   : > { %v659_v39 = vpop.f32.mrf.mxu1 }
  0xf3   : > { %v660_v4 = vadd.f32 %v659_v39, %v562_v38 }
 0x104   : > { %v3964_v40 = vpop.f32.mrf.mxu0 }
 0x105   : > { %v3994_v41 = vpop.f32.mrf.mxu1 }
 0x106   : > { %v572_v42 = vpop.f32.mrf.mxu0  ;;  %v675_v14 = vadd.f32 %v3994_v41, %v3964_v40 }
 0x107   : > { %v669_v43 = vpop.f32.mrf.mxu1 }
 0x108   : > { %v670_v15 = vadd.f32 %v669_v43, %v572_v42 }
 0x10b   : > { %v4021_v44 = vpop.f32.mrf.mxu0 }
 0x10c   : > { %v4051_v45 = vpop.f32.mrf.mxu1 }
 0x10d   : > { %v757_v46 = vpop.f32.mrf.mxu0  ;;  %v848_v3 = vadd.f32 %v4051_v45, %v4021_v44 }
 0x10e   : > { %v842_v47 = vpop.f32.mrf.mxu1 }
 0x10f   : > { %v843_v5 = vadd.f32 %v842_v47, %v757_v46 }
 0x120   : > { %v4024_v48 = vpop.f32.mrf.mxu0 }
 0x121   : > { %v4054_v49 = vpop.f32.mrf.mxu1 }
 0x122   : > { %v767_v50 = vpop.f32.mrf.mxu0  ;;  %v858_v16 = vadd.f32 %v4054_v49, %v4024_v48 }
 0x123   : > { %v852_v51 = vpop.f32.mrf.mxu1 }
 0x124   : > { %v853_v24 = vadd.f32 %v852_v51, %v767_v50 }
 0x127   : > { %v4081_v52 = vpop.f32.mrf.mxu0 }
 0x128   : > { %v4111_v53 = vpop.f32.mrf.mxu1  ;;  %v976_v6 = vadd.f32 %v4081_v52, %v665_v2 }
 0x129   : > { %v956_v54 = vpop.f32.mrf.mxu0  ;;  %v1078_v7 = vadd.f32 %v4111_v53, %v848_v3 }
 0x12a   : > { %v1058_v55 = vpop.f32.mrf.mxu1  ;;  %v975_v10 = vadd.f32 %v956_v54, %v660_v4 }
 0x12b   : > { %v1077_v11 = vadd.f32 %v1058_v55, %v843_v5 }
 0x12d   : > { %v4084_v56 = vpop.f32.mrf.mxu0 }
 0x12e   : > { %v4114_v57 = vpop.f32.mrf.mxu1  ;;  %v978_v25 = vadd.f32 %v4084_v56, %v675_v14 }
 0x12f   : > { %v966_v58 = vpop.f32.mrf.mxu0  ;;  %v1080_v26 = vadd.f32 %v4114_v57, %v858_v16  ;;  %v3417_v16 = vld [vmem:[%s6126_s5 + $0xa0] sm:$0xff] }
 0x130   : > { %v1068_v59 = vpop.f32.mrf.mxu1  ;;  %v977_v27 = vadd.f32 %v966_v58, %v670_v15 }
 0x131   : > { %v1079_v36 = vadd.f32 %v1068_v59, %v853_v24  ;;  %v3412_v24 = vld [vmem:[%s6126_s5 + $0x78] sm:$0xff] }
 0x143   : > { %v4141_v60 = vpop.f32.mrf.mxu0 }
 0x144   : > { %v4171_v61 = vpop.f32.mrf.mxu1  ;;  %v1196_v12 = vadd.f32 %v4141_v60, %v976_v6 }
 0x145   : > { %v1176_v62 = vpop.f32.mrf.mxu0  ;;  %v1298_v13 = vadd.f32 %v4171_v61, %v1078_v7 }
 0x146   : > { %v1278_v63 = vpop.f32.mrf.mxu1  ;;  %v1195_v20 = vadd.f32 %v1176_v62, %v975_v10 }
 0x147   : > { %v1297_v21 = vadd.f32 %v1278_v63, %v1077_v11 }
 0x149   : > { %v4144_v0 = vpop.f32.mrf.mxu0 }
 0x14a   : > { %v4174_v1 = vpop.f32.mrf.mxu1  ;;  %v1198_v37 = vadd.f32 %v4144_v0, %v978_v25  ;;  %v1598_v25 = vld [vmem:[%s6126_s5 + $0x18] sm:$0xff] }
 0x14b   : > { %v1186_v8 = vpop.f32.mrf.mxu0  ;;  %v1300_v38 = vadd.f32 %v4174_v1, %v1080_v26  ;;  %v3411_v26 = vld [vmem:[%s6126_s5 + $0x70] sm:$0xff] }
 0x14c   : > { %v1288_v9 = vpop.f32.mrf.mxu1  ;;  %v1197_v39 = vadd.f32 %v1186_v8, %v977_v27  ;;  %v1597_v27 = vld [vmem:[%s6126_s5 + $0x10] sm:$0xff] }
 0x14d   : > { %v1299_v46 = vadd.f32 %v1288_v9, %v1079_v36  ;;  %v3435_v36 = vld [vmem:[%s6125_s4 + $0x100] sm:$0xf] }
 0x15f   : > { %v4201_v17 = vpop.f32.mrf.mxu0 }
 0x160   : > { %v4231_v19 = vpop.f32.mrf.mxu1  ;;  %v1416_v22 = vadd.f32 %v4201_v17, %v1196_v12  ;;  %v1604_v12 = vld [vmem:[%s6126_s5 + $0x48] sm:$0xff]  ;;  %v1603_v17 = vld [vmem:[%s6126_s5 + $0x40] sm:$0xff] }
 0x161   : > { %v1518_v23 = vadd.f32 %v4231_v19, %v1298_v13  ;;  %v1396_v28 = vpop.f32.mrf.mxu0  ;;  %v1601_v19 = vld [vmem:[%s6126_s5 + $0x30] sm:$0xff] }
 0x162   : > { %v1498_v29 = vpop.f32.mrf.mxu1  ;;  %v1529_v30 = vadd.f32 %v3390_v18, %v1416_v22  ;;  %v1415_v32 = vadd.f32 %v1396_v28, %v1195_v20  ;;  %v3414_v20 = vld [vmem:[%s6126_s5 + $0x88] sm:$0xff]  ;;  %v3413_v22 = vld [vmem:[%s6126_s5 + $0x80] sm:$0xff] }
 0x163   : > { %v1537_v31 = vadd.f32 %v3390_v18, %v1518_v23  ;;  %v1517_v33 = vadd.f32 %v1498_v29, %v1297_v21  ;;  %v4204_v40 = vpop.f32.mrf.mxu0  ;;  %v1600_v21 = vld [vmem:[%s6126_s5 + $0x28] sm:$0xff]  ;;  %v1599_v23 = vld [vmem:[%s6126_s5 + $0x20] sm:$0xff] }
 0x164   : > { %v4234_v41 = vpop.f32.mrf.mxu1  ;;  %v1533_v42 = vmax.f32 %v1529_v30, 0.0  ;;  %v1528_v44 = vadd.f32 %v3390_v18, %v1415_v32  ;;  %v1418_v47 = vadd.f32 %v4204_v40, %v1198_v37  ;;  %v3410_v28 = vld [vmem:[%s6126_s5 + $0x68] sm:$0xff]  ;;  %v3409_v30 = vld [vmem:[%s6126_s5 + $0x60] sm:$0xff]  ;;  %v3408_v32 = vld [vmem:[%s6126_s5 + $0x58] sm:$0xff] }
 0x165   : > { %v1541_v43 = vmax.f32 %v1537_v31, 0.0  ;;  %v1536_v45 = vadd.f32 %v3390_v18, %v1517_v33  ;;  %v1520_v48 = vadd.f32 %v4234_v41, %v1300_v38  ;;  %v1406_v49 = vpop.f32.mrf.mxu0  ;;  %v1596_v29 = vld [vmem:[%s6126_s5 + $0x8] sm:$0xff]  ;;  %v1595_v31 = vld [vmem:[%s6126_s5] sm:$0xff]  ;;  %v3448_v37 = vld [vmem:[%s6126_s5 + $0xf8] sm:$0xff] }
 0x166   : > { %v1508_v50 = vpop.f32.mrf.mxu1  ;;  %v1532_v52 = vmax.f32 %v1528_v44, 0.0  ;;  %v1417_v54 = vadd.f32 %v1406_v49, %v1197_v39  ;;  %v1531_v55 = vadd.f32 %v3390_v18, %v1418_v47  ;;  %v3449_v33 = vld [vmem:[%s6126_s5 + $0x100] sm:$0xf]  ;;  %v3434_v39 = vld [vmem:[%s6125_s4 + $0xf8] sm:$0xff]  ;;  %v3447_v40 = vld [vmem:[%s6126_s5 + $0xf0] sm:$0xff] }
 0x167   : > { %v1545_v51 = vmax.f32 %v1533_v42, %v1541_v43  ;;  %v1540_v53 = vmax.f32 %v1536_v45, 0.0  ;;  %v1539_v56 = vadd.f32 %v3390_v18, %v1520_v48  ;;  %v1519_v57 = vadd.f32 %v1508_v50, %v1299_v46  ;;  %v3433_v41 = vld [vmem:[%s6125_s4 + $0xf0] sm:$0xff]  ;;  %v3446_v42 = vld [vmem:[%s6126_s5 + $0xe8] sm:$0xff]  ;;  %v3445_v44 = vld [vmem:[%s6126_s5 + $0xe0] sm:$0xff] }
 0x168   : > { %v1530_v60 = vadd.f32 %v3390_v18, %v1417_v54  ;;  %v1535_v61 = vmax.f32 %v1531_v55, 0.0  ;;  %v3432_v43 = vld [vmem:[%s6125_s4 + $0xe8] sm:$0xff]  ;;  %v3431_v45 = vld [vmem:[%s6125_s4 + $0xe0] sm:$0xff]  ;;  %v3444_v46 = vld [vmem:[%s6126_s5 + $0xd8] sm:$0xff] }
 0x169   : > { %v1561_v58 = vrot.slane %v1545_v51, 1  ;;  %v1544_v59 = vmax.f32 %v1532_v52, %v1540_v53  ;;  %v1543_v62 = vmax.f32 %v1539_v56, 0.0  ;;  %v1538_v63 = vadd.f32 %v3390_v18, %v1519_v57  ;;  %v3416_v18 = vld [vmem:[%s6126_s5 + $0x98] sm:$0xff]  ;;  %v3443_v48 = vld [vmem:[%s6126_s5 + $0xd0] sm:$0xff]  ;;  %v3442_v50 = vld [vmem:[%s6126_s5 + $0xc8] sm:$0xff] }
 0x16a   : > { %v1534_v2 = vmax.f32 %v1530_v60, 0.0  ;;  %v3430_v47 = vld [vmem:[%s6125_s4 + $0xd8] sm:$0xff]  ;;  %v3429_v49 = vld [vmem:[%s6125_s4 + $0xd0] sm:$0xff]  ;;  %v3441_v52 = vld [vmem:[%s6126_s5 + $0xc0] sm:$0xff] }
 0x16b   : > { %v1563_v0 = vmax.f32 %v1545_v51, %v1561_v58  ;;  %v1549_v1 = vrot.slane %v1544_v59, 1  ;;  %v1547_v3 = vmax.f32 %v1535_v61, %v1543_v62  ;;  %v1542_v4 = vmax.f32 %v1538_v63, 0.0  ;;  %v3428_v51 = vld [vmem:[%s6125_s4 + $0xc8] sm:$0xff]  ;;  %v3427_v53 = vld [vmem:[%s6125_s4 + $0xc0] sm:$0xff]  ;;  %v3440_v54 = vld [vmem:[%s6126_s5 + $0xb8] sm:$0xff] }
 0x16c   : > { %v3426_v55 = vld [vmem:[%s6125_s4 + $0xb8] sm:$0xff]  ;;  %v3439_v56 = vld [vmem:[%s6126_s5 + $0xb0] sm:$0xff] }
 0x16d   : > { %1566 = vst.msk [vmem:[#allocation2 + $0x2] sm:$0x10] %vm1556_vm2, %v1563_v0  ;;  %v1551_v5 = vmax.f32 %v1544_v59, %v1549_v1  ;;  %v1577_v6 = vrot.slane %v1547_v3, 1  ;;  %v1546_v7 = vmax.f32 %v1534_v2, %v1542_v4  ;;  %v3425_v57 = vld [vmem:[%s6125_s4 + $0xb0] sm:$0xff]  ;;  %v3477_v58 = vld [vmem:[%s6126_s5 + $0x158] sm:$0xf] }
 0x16e   : > { %1567 = vst.msk [vmem:[#allocation2 + $0x1] sm:$0x40] %vm1558_vm3, %v1563_v0  ;;  %v3463_v60 = vld [vmem:[%s6125_s4 + $0x158] sm:$0xf]  ;;  %v3476_v61 = vld [vmem:[%s6126_s5 + $0x150] sm:$0xff]  ;;  %v3461_v1 = vld [vmem:[%s6125_s4 + $0x148] sm:$0xff] }
 0x16f   : > { %1564 = vst.msk [vmem:[#allocation2 + $0x4] sm:$0x1] %vm1552_vm4, %v1563_v0  ;;  %1553 = vst.msk [vmem:[#allocation2] sm:$0x1] %vm1552_vm4, %v1551_v5  ;;  %v1579_v8 = vmax.f32 %v1547_v3, %v1577_v6  ;;  %v1569_v9 = vrot.slane %v1546_v7, 1  ;;  %v3462_v63 = vld [vmem:[%s6125_s4 + $0x150] sm:$0xff] }
 0x170   : > { %1565 = vst.msk [vmem:[#allocation2 + $0x3] sm:$0x4] %vm1554_vm5, %v1563_v0  ;;  %1555 = vst.msk [vmem:[#allocation2 - $0x1] sm:$0x4] %vm1554_vm5, %v1551_v5  ;;  %v3475_v0 = vld [vmem:[%s6126_s5 + $0x148] sm:$0xff]  ;;  %v3474_v2 = vld [vmem:[%s6126_s5 + $0x140] sm:$0xff] }
 0x171   : > { %1557 = vst.msk [vmem:[#allocation2 - $0x2] sm:$0x10] %vm1556_vm2, %v1551_v5  ;;  %v1571_v10 = vmax.f32 %v1546_v7, %v1569_v9  ;;  %v3460_v3 = vld [vmem:[%s6125_s4 + $0x140] sm:$0xff]  ;;  %v3473_v4 = vld [vmem:[%s6126_s5 + $0x138] sm:$0xff]  ;;  %v3472_v6 = vld [vmem:[%s6126_s5 + $0x130] sm:$0xff] }
 0x172   : > { %1559 = vst.msk [vmem:[#allocation2 - $0x3] sm:$0x40] %vm1558_vm3, %v1551_v5  ;;  %v3459_v5 = vld [vmem:[%s6125_s4 + $0x138] sm:$0xff]  ;;  %v3458_v7 = vld [vmem:[%s6125_s4 + $0x130] sm:$0xff]  ;;  %v3457_v9 = vld [vmem:[%s6125_s4 + $0x128] sm:$0xff] }
 0x173   : > { %1580 = vst.msk [vmem:[#allocation2 + $0xc] sm:$0x1] %vm1552_vm4, %v1579_v8  ;;  %1572 = vst.msk [vmem:[#allocation2 + $0x8] sm:$0x1] %vm1552_vm4, %v1571_v10 }
 0x174   : > { %1581 = vst.msk [vmem:[#allocation2 + $0xb] sm:$0x4] %vm1554_vm5, %v1579_v8  ;;  %1573 = vst.msk [vmem:[#allocation2 + $0x7] sm:$0x4] %vm1554_vm5, %v1571_v10  ;;  %v3471_v8 = vld [vmem:[%s6126_s5 + $0x128] sm:$0xff] }
 0x175   : > { %1574 = vst.msk [vmem:[#allocation2 + $0x6] sm:$0x10] %vm1556_vm2, %v1571_v10 }
 0x176   : > { %1575 = vst.msk [vmem:[#allocation2 + $0x5] sm:$0x40] %vm1558_vm3, %v1571_v10  ;;  %v3470_v10 = vld [vmem:[%s6126_s5 + $0x120] sm:$0xff] }
 0x179   : > { %v1582_v11 = vld [vmem:[#allocation2] sm:$0xff] }
 0x17a   : > { %4282 = vmatprep.mubr.msk.f32.mxu1 %vm1620_vm6, %v1582_v11  ;;  %v1606_v13 = vld [vmem:[#allocation2 + $0x1] sm:$0xff] }
 0x17b   : > { %v5446_v14 = vld [vmem:[#allocation2 + $0x8] sm:$0x3]  ;;  %4257 = vmatprep.mubr.msk.f32.mxu0 %vm1620_vm6, %v1606_v13 }
 0x17c   : > { %v5448_v15 = vld [vmem:[#allocation2 + $0x9] sm:$0x3]  ;;  %4283 = vmatmul.mubr.msk.f32.vlgmr.msra.gmra.mxu1 %vm1620_vm6, %v5446_v14 }
 0x17d   : > { %4311 = vmatpush3.msk.msra.mxu1 %vm1627_vm1, %v5414_v34  ;;  %4258 = vmatmul.mubr.msk.f32.vlgmr.msra.gmra.mxu0 %vm1620_vm6, %v5448_v15  ;;  %v1602_v34 = vld [vmem:[%s6126_s5 + $0x38] sm:$0xff]  ;;  %v1958_v38 = vld [vmem:[#allocation2 + $0x2] sm:$0xff]  ;;  %v1959_v59 = vld [vmem:[#allocation2 + $0xa] sm:$0x3] }
 0x17e   : > { %4286 = vmatpush3.msk.msra.mxu0 %vm1627_vm1, %v5421_v35  ;;  %4312 = vmatprep.subr.mxu1 %v1604_v12  ;;  %v3415_v35 = vld [vmem:[%s6126_s5 + $0x90] sm:$0xff]  ;;  %v2150_v62 = vld [vmem:[#allocation2 + $0x3] sm:$0xff] }
 0x17f   : > { %4332 = vmatprep.mubr.msk.f32.mxu1 %vm1620_vm6, %v1582_v11  ;;  %4287 = vmatprep.subr.mxu0 %v3417_v16  ;;  %v3456_v11 = vld [vmem:[%s6125_s4 + $0x120] sm:$0xff] }
 0x180   : > { %4307 = vmatprep.mubr.msk.f32.mxu0 %vm1620_vm6, %v1606_v13  ;;  %4313 = vmatpush3.msra.mxu1 %v1604_v12  ;;  %v3469_v12 = vld [vmem:[%s6126_s5 + $0x118] sm:$0xff] }
 0x181   : > { %4288 = vmatpush3.msra.mxu0 %v3417_v16  ;;  %4314 = vmatprep.subr.mxu1 %v1603_v17  ;;  %v3455_v13 = vld [vmem:[%s6125_s4 + $0x118] sm:$0xff]  ;;  %v3467_v16 = vld [vmem:[%s6126_s5 + $0x108] sm:$0xff] }
 0x182   : > { %4289 = vmatprep.subr.mxu0 %v3416_v18  ;;  %4315 = vmatpush3.msra.mxu1 %v1603_v17  ;;  %v3453_v17 = vld [vmem:[%s6125_s4 + $0x108] sm:$0xff] }
 0x183   : > { %4290 = vmatpush3.msra.mxu0 %v3416_v18  ;;  %4316 = vmatprep.subr.mxu1 %v1602_v34  ;;  %v3505_v18 = vld [vmem:[%s6126_s5 + $0x1b0] sm:$0xf] }
 0x184   : > { %4291 = vmatprep.subr.mxu0 %v3415_v35  ;;  %4317 = vmatpush3.msra.mxu1 %v1602_v34  ;;  %v2151_v34 = vld [vmem:[#allocation2 + $0xb] sm:$0x3] }
 0x185   : > { %4292 = vmatpush3.msra.mxu0 %v3415_v35  ;;  %4318 = vmatprep.subr.mxu1 %v1601_v19  ;;  %v3491_v35 = vld [vmem:[%s6125_s4 + $0x1b0] sm:$0xf] }
 0x186   : > { %4293 = vmatprep.subr.mxu0 %v3414_v20  ;;  %4319 = vmatpush3.msra.mxu1 %v1601_v19  ;;  %v3504_v19 = vld [vmem:[%s6126_s5 + $0x1a8] sm:$0xff] }
 0x187   : > { %4294 = vmatpush3.msra.mxu0 %v3414_v20  ;;  %4320 = vmatprep.subr.mxu1 %v1600_v21  ;;  %v2342_v20 = vld [vmem:[#allocation2 + $0x4] sm:$0xff] }
 0x188   : > { %4295 = vmatprep.subr.mxu0 %v3413_v22  ;;  %4321 = vmatpush3.msra.mxu1 %v1600_v21  ;;  %v3490_v21 = vld [vmem:[%s6125_s4 + $0x1a8] sm:$0xff] }
 0x189   : > { %4296 = vmatpush3.msra.mxu0 %v3413_v22  ;;  %4322 = vmatprep.subr.mxu1 %v1599_v23  ;;  %v3503_v22 = vld [vmem:[%s6126_s5 + $0x1a0] sm:$0xff] }
 0x18a   : > { %4297 = vmatprep.subr.mxu0 %v3412_v24  ;;  %4323 = vmatpush3.msra.mxu1 %v1599_v23  ;;  %v3489_v23 = vld [vmem:[%s6125_s4 + $0x1a0] sm:$0xff] }
 0x18b   : > { %4298 = vmatpush3.msra.mxu0 %v3412_v24  ;;  %4324 = vmatprep.subr.mxu1 %v1598_v25  ;;  %v3502_v24 = vld [vmem:[%s6126_s5 + $0x198] sm:$0xff] }
 0x18c   : > { %4299 = vmatprep.subr.mxu0 %v3411_v26  ;;  %4325 = vmatpush3.msra.mxu1 %v1598_v25  ;;  %v3488_v25 = vld [vmem:[%s6125_s4 + $0x198] sm:$0xff] }
 0x18d   : > { %4300 = vmatpush3.msra.mxu0 %v3411_v26  ;;  %4326 = vmatprep.subr.mxu1 %v1597_v27  ;;  %v3501_v26 = vld [vmem:[%s6126_s5 + $0x190] sm:$0xff] }
 0x18e   : > { %4301 = vmatprep.subr.mxu0 %v3410_v28  ;;  %4327 = vmatpush3.msra.mxu1 %v1597_v27  ;;  %v3487_v27 = vld [vmem:[%s6125_s4 + $0x190] sm:$0xff] }
 0x18f   : > { %4302 = vmatpush3.msra.mxu0 %v3410_v28  ;;  %4328 = vmatprep.subr.mxu1 %v1596_v29  ;;  %v3500_v28 = vld [vmem:[%s6126_s5 + $0x188] sm:$0xff] }
 0x190   : > { %4303 = vmatprep.subr.mxu0 %v3409_v30  ;;  %4329 = vmatpush3.msra.mxu1 %v1596_v29  ;;  %v3486_v29 = vld [vmem:[%s6125_s4 + $0x188] sm:$0xff] }
 0x191   : > { %4304 = vmatpush3.msra.mxu0 %v3409_v30  ;;  %4330 = vmatprep.subr.mxu1 %v1595_v31  ;;  %v3499_v30 = vld [vmem:[%s6126_s5 + $0x180] sm:$0xff] }
 0x192   : > { %4305 = vmatprep.subr.mxu0 %v3408_v32  ;;  %4331 = vmatpush3.msra.mxu1 %v1595_v31  ;;  %v3485_v31 = vld [vmem:[%s6125_s4 + $0x180] sm:$0xff] }
 0x193   : > { %4306 = vmatpush3.msra.mxu0 %v3408_v32  ;;  %4333 = vmatmul.mubr.msk.f32.vlgmr.msra.gmra.mxu1 %vm1620_vm6, %v5446_v14  ;;  %v3468_v14 = vld [vmem:[%s6126_s5 + $0x110] sm:$0xff]  ;;  %v3498_v32 = vld [vmem:[%s6126_s5 + $0x178] sm:$0xff] }
 0x194   : > { %4360 = vmatprep.subr.msk.mxu1 %vm1627_vm1, %v3449_v33  ;;  %4308 = vmatmul.mubr.msk.f32.vlgmr.msra.gmra.mxu0 %vm1620_vm6, %v5448_v15  ;;  %v3454_v15 = vld [vmem:[%s6125_s4 + $0x110] sm:$0xff] }
 0x195   : > { %4335 = vmatprep.subr.msk.mxu0 %vm1627_vm1, %v3435_v36  ;;  %4361 = vmatpush3.msk.msra.mxu1 %vm1627_vm1, %v3449_v33  ;;  %v3484_v33 = vld [vmem:[%s6125_s4 + $0x178] sm:$0xff] }
 0x196   : > { %4382 = vmatprep.mubr.msk.f32.mxu1 %vm1620_vm6, %v1958_v38  ;;  %4336 = vmatpush3.msk.msra.mxu0 %vm1627_vm1, %v3435_v36  ;;  %v3497_v36 = vld [vmem:[%s6126_s5 + $0x170] sm:$0xff] }
 0x197   : > { %4357 = vmatprep.mubr.msk.f32.mxu0 %vm1620_vm6, %v1958_v38  ;;  %4362 = vmatprep.subr.mxu1 %v3448_v37  ;;  %v3496_v38 = vld [vmem:[%s6126_s5 + $0x168] sm:$0xff] }
 0x198   : > { %4337 = vmatprep.subr.mxu0 %v3434_v39  ;;  %4363 = vmatpush3.msra.mxu1 %v3448_v37  ;;  %v3483_v37 = vld [vmem:[%s6125_s4 + $0x170] sm:$0xff] }
 0x199   : > { %4338 = vmatpush3.msra.mxu0 %v3434_v39  ;;  %4364 = vmatprep.subr.mxu1 %v3447_v40  ;;  %v3482_v39 = vld [vmem:[%s6125_s4 + $0x168] sm:$0xff] }
 0x19a   : > { %4339 = vmatprep.subr.mxu0 %v3433_v41  ;;  %4365 = vmatpush3.msra.mxu1 %v3447_v40  ;;  %v3495_v40 = vld [vmem:[%s6126_s5 + $0x160] sm:$0xff] }
 0x19b   : > { %4340 = vmatpush3.msra.mxu0 %v3433_v41  ;;  %4366 = vmatprep.subr.mxu1 %v3446_v42  ;;  %v3481_v41 = vld [vmem:[%s6125_s4 + $0x160] sm:$0xff] }
 0x19c   : > { %4341 = vmatprep.subr.mxu0 %v3432_v43  ;;  %4367 = vmatpush3.msra.mxu1 %v3446_v42  ;;  %v2343_v42 = vld [vmem:[#allocation2 + $0xc] sm:$0x3] }
 0x19d   : > { %4342 = vmatpush3.msra.mxu0 %v3432_v43  ;;  %4368 = vmatprep.subr.mxu1 %v3445_v44  ;;  %v4761_v43 = vmov 0.0  }
 0x19e   : > { %4343 = vmatprep.subr.mxu0 %v3431_v45  ;;  %4369 = vmatpush3.msra.mxu1 %v3445_v44  ;;  %v3519_v44 = vld [vmem:[%s6128_s7 + $0x98] sm:$0xff] }
 0x19f   : > { %4344 = vmatpush3.msra.mxu0 %v3431_v45  ;;  %4370 = vmatprep.subr.mxu1 %v3444_v46  ;;  %v2578_v45 = vld [vmem:[%s6128_s7 + $0x48] sm:$0xff] }
 0x1a0   : > { %4345 = vmatprep.subr.mxu0 %v3430_v47  ;;  %4371 = vmatpush3.msra.mxu1 %v3444_v46  ;;  %v3518_v46 = vld [vmem:[%s6128_s7 + $0x90] sm:$0xff] }
 0x1a1   : > { %4346 = vmatpush3.msra.mxu0 %v3430_v47  ;;  %4372 = vmatprep.subr.mxu1 %v3443_v48  ;;  %v2577_v47 = vld [vmem:[%s6128_s7 + $0x40] sm:$0xff] }
 0x1a2   : > { %4347 = vmatprep.subr.mxu0 %v3429_v49  ;;  %4373 = vmatpush3.msra.mxu1 %v3443_v48  ;;  %v3517_v48 = vld [vmem:[%s6128_s7 + $0x88] sm:$0xff] }
 0x1a3   : > { %4348 = vmatpush3.msra.mxu0 %v3429_v49  ;;  %4374 = vmatprep.subr.mxu1 %v3442_v50  ;;  %v2576_v49 = vld [vmem:[%s6128_s7 + $0x38] sm:$0xff] }
 0x1a4   : > { %4349 = vmatprep.subr.mxu0 %v3428_v51  ;;  %4375 = vmatpush3.msra.mxu1 %v3442_v50  ;;  %v3516_v50 = vld [vmem:[%s6128_s7 + $0x80] sm:$0xff] }
 0x1a5   : > { %4350 = vmatpush3.msra.mxu0 %v3428_v51  ;;  %4376 = vmatprep.subr.mxu1 %v3441_v52  ;;  %v2575_v51 = vld [vmem:[%s6128_s7 + $0x30] sm:$0xff] }
 0x1a6   : > { %4351 = vmatprep.subr.mxu0 %v3427_v53  ;;  %4377 = vmatpush3.msra.mxu1 %v3441_v52  ;;  %v3515_v52 = vld [vmem:[%s6128_s7 + $0x78] sm:$0xff] }
 0x1a7   : > { %4352 = vmatpush3.msra.mxu0 %v3427_v53  ;;  %4378 = vmatprep.subr.mxu1 %v3440_v54  ;;  %v2574_v53 = vld [vmem:[%s6128_s7 + $0x28] sm:$0xff] }
 0x1a8   : > { %4353 = vmatprep.subr.mxu0 %v3426_v55  ;;  %4379 = vmatpush3.msra.mxu1 %v3440_v54  ;;  %v3514_v54 = vld [vmem:[%s6128_s7 + $0x70] sm:$0xff] }
 0x1a9   : > { %4354 = vmatpush3.msra.mxu0 %v3426_v55  ;;  %4380 = vmatprep.subr.mxu1 %v3439_v56  ;;  %v2573_v55 = vld [vmem:[%s6128_s7 + $0x20] sm:$0xff] }
 0x1aa   : > { %4355 = vmatprep.subr.mxu0 %v3425_v57  ;;  %4381 = vmatpush3.msra.mxu1 %v3439_v56  ;;  %v3513_v56 = vld [vmem:[%s6128_s7 + $0x68] sm:$0xff] }
 0x1ab   : > { %4356 = vmatpush3.msra.mxu0 %v3425_v57  ;;  %4383 = vmatmul.mubr.msk.f32.vlgmr.msra.gmra.mxu1 %vm1620_vm6, %v1959_v59  ;;  %v2572_v57 = vld [vmem:[%s6128_s7 + $0x18] sm:$0xff] }
 0x1ac   : > { %4410 = vmatprep.subr.msk.mxu1 %vm1627_vm1, %v3477_v58  ;;  %4358 = vmatmul.mubr.msk.f32.vlgmr.msra.gmra.mxu0 %vm1620_vm6, %v1959_v59  ;;  %v2571_v59 = vld [vmem:[%s6128_s7 + $0x10] sm:$0xff] }
 0x1ad   : > { %4385 = vmatprep.subr.msk.mxu0 %vm1627_vm1, %v3463_v60  ;;  %4411 = vmatpush3.msk.msra.mxu1 %vm1627_vm1, %v3477_v58  ;;  %v3512_v58 = vld [vmem:[%s6128_s7 + $0x60] sm:$0xff] }
 0x1ae   : > { %4432 = vmatprep.mubr.msk.f32.mxu1 %vm1620_vm6, %v2150_v62  ;;  %4386 = vmatpush3.msk.msra.mxu0 %vm1627_vm1, %v3463_v60  ;;  %v3511_v60 = vld [vmem:[%s6128_s7 + $0x58] sm:$0xff] }
 0x1af   : > { %4407 = vmatprep.mubr.msk.f32.mxu0 %vm1620_vm6, %v2150_v62  ;;  %4412 = vmatprep.subr.mxu1 %v3476_v61  ;;  %v3510_v62 = vld [vmem:[%s6128_s7 + $0x50] sm:$0xff] }
 0x1b0   : > { %4387 = vmatprep.subr.mxu0 %v3462_v63  ;;  %4413 = vmatpush3.msra.mxu1 %v3476_v61  ;;  %v2570_v61 = vld [vmem:[%s6128_s7 + $0x8] sm:$0xff] }
 0x1b1   : > { %4388 = vmatpush3.msra.mxu0 %v3462_v63  ;;  %4414 = vmatprep.subr.mxu1 %v3475_v0  ;;  %v2569_v63 = vld [vmem:[%s6128_s7] sm:$0xff] }
 0x1b2   : > { %4389 = vmatprep.subr.mxu0 %v3461_v1  ;;  %4415 = vmatpush3.msra.mxu1 %v3475_v0 }
 0x1b3   : > { %4390 = vmatpush3.msra.mxu0 %v3461_v1  ;;  %4416 = vmatprep.subr.mxu1 %v3474_v2 }
 0x1b4   : > { %4391 = vmatprep.subr.mxu0 %v3460_v3  ;;  %4417 = vmatpush3.msra.mxu1 %v3474_v2 }
 0x1b5   : > { %4392 = vmatpush3.msra.mxu0 %v3460_v3  ;;  %4418 = vmatprep.subr.mxu1 %v3473_v4 }
 0x1b6   : > { %4393 = vmatprep.subr.mxu0 %v3459_v5  ;;  %4419 = vmatpush3.msra.mxu1 %v3473_v4 }
 0x1b7   : > { %4394 = vmatpush3.msra.mxu0 %v3459_v5  ;;  %4420 = vmatprep.subr.mxu1 %v3472_v6 }
 0x1b8   : > { %4395 = vmatprep.subr.mxu0 %v3458_v7  ;;  %4421 = vmatpush3.msra.mxu1 %v3472_v6 }
 0x1b9   : > { %4396 = vmatpush3.msra.mxu0 %v3458_v7  ;;  %4422 = vmatprep.subr.mxu1 %v3471_v8 }
 0x1ba   : > { %4397 = vmatprep.subr.mxu0 %v3457_v9  ;;  %4423 = vmatpush3.msra.mxu1 %v3471_v8 }
 0x1bb   : > { %4398 = vmatpush3.msra.mxu0 %v3457_v9  ;;  %4424 = vmatprep.subr.mxu1 %v3470_v10 }
 0x1bc   : > { %4399 = vmatprep.subr.mxu0 %v3456_v11  ;;  %4425 = vmatpush3.msra.mxu1 %v3470_v10 }
 0x1bd   : > { %4400 = vmatpush3.msra.mxu0 %v3456_v11  ;;  %4426 = vmatprep.subr.mxu1 %v3469_v12 }
 0x1be   : > { %4401 = vmatprep.subr.mxu0 %v3455_v13  ;;  %4427 = vmatpush3.msra.mxu1 %v3469_v12 }
 0x1bf   : > { %4402 = vmatpush3.msra.mxu0 %v3455_v13  ;;  %4428 = vmatprep.subr.mxu1 %v3468_v14 }
 0x1c0   : > { %4403 = vmatprep.subr.mxu0 %v3454_v15  ;;  %4429 = vmatpush3.msra.mxu1 %v3468_v14 }
 0x1c1   : > { %4404 = vmatpush3.msra.mxu0 %v3454_v15  ;;  %4430 = vmatprep.subr.mxu1 %v3467_v16 }
 0x1c2   : > { %4405 = vmatprep.subr.mxu0 %v3453_v17  ;;  %4431 = vmatpush3.msra.mxu1 %v3467_v16 }
 0x1c3   : > { %4406 = vmatpush3.msra.mxu0 %v3453_v17  ;;  %4433 = vmatmul.mubr.msk.f32.vlgmr.msra.gmra.mxu1 %vm1620_vm6, %v2151_v34 }
 0x1c4   : > { %4460 = vmatprep.subr.msk.mxu1 %vm1627_vm1, %v3505_v18  ;;  %4408 = vmatmul.mubr.msk.f32.vlgmr.msra.gmra.mxu0 %vm1620_vm6, %v2151_v34 }
 0x1c5   : > { %4435 = vmatprep.subr.msk.mxu0 %vm1627_vm1, %v3491_v35  ;;  %4461 = vmatpush3.msk.msra.mxu1 %vm1627_vm1, %v3505_v18 }
 0x1c6   : > { %4482 = vmatprep.mubr.msk.f32.mxu1 %vm1620_vm6, %v2342_v20  ;;  %4436 = vmatpush3.msk.msra.mxu0 %vm1627_vm1, %v3491_v35 }
 0x1c7   : > { %4457 = vmatprep.mubr.msk.f32.mxu0 %vm1620_vm6, %v2342_v20  ;;  %4462 = vmatprep.subr.mxu1 %v3504_v19 }
 0x1c8   : > { %4437 = vmatprep.subr.mxu0 %v3490_v21  ;;  %4463 = vmatpush3.msra.mxu1 %v3504_v19 }
 0x1c9   : > { %4438 = vmatpush3.msra.mxu0 %v3490_v21  ;;  %4464 = vmatprep.subr.mxu1 %v3503_v22 }
 0x1ca   : > { %4439 = vmatprep.subr.mxu0 %v3489_v23  ;;  %4465 = vmatpush3.msra.mxu1 %v3503_v22 }
 0x1cb   : > { %4440 = vmatpush3.msra.mxu0 %v3489_v23  ;;  %4466 = vmatprep.subr.mxu1 %v3502_v24 }
 0x1cc   : > { %4441 = vmatprep.subr.mxu0 %v3488_v25  ;;  %4467 = vmatpush3.msra.mxu1 %v3502_v24 }
 0x1cd   : > { %4442 = vmatpush3.msra.mxu0 %v3488_v25  ;;  %4468 = vmatprep.subr.mxu1 %v3501_v26  ;;  %v3509_v25 = vld [vmem:[%s6127_s6] ss:$0 sm:$0xff] }
 0x1ce   : > { %4443 = vmatprep.subr.mxu0 %v3487_v27  ;;  %4469 = vmatpush3.msra.mxu1 %v3501_v26 }
 0x1cf   : > { %4444 = vmatpush3.msra.mxu0 %v3487_v27  ;;  %4470 = vmatprep.subr.mxu1 %v3500_v28 }
 0x1d0   : > { %4445 = vmatprep.subr.mxu0 %v3486_v29  ;;  %4471 = vmatpush3.msra.mxu1 %v3500_v28 }
 0x1d1   : > { %4446 = vmatpush3.msra.mxu0 %v3486_v29  ;;  %4472 = vmatprep.subr.mxu1 %v3499_v30 }
 0x1d2   : > { %4447 = vmatprep.subr.mxu0 %v3485_v31  ;;  %4473 = vmatpush3.msra.mxu1 %v3499_v30 }
 0x1d3   : > { %4448 = vmatpush3.msra.mxu0 %v3485_v31  ;;  %4474 = vmatprep.subr.mxu1 %v3498_v32 }
 0x1d4   : > { %4449 = vmatprep.subr.mxu0 %v3484_v33  ;;  %4475 = vmatpush3.msra.mxu1 %v3498_v32 }
 0x1d5   : > { %4450 = vmatpush3.msra.mxu0 %v3484_v33  ;;  %4476 = vmatprep.subr.mxu1 %v3497_v36 }
 0x1d6   : > { %4451 = vmatprep.subr.mxu0 %v3483_v37  ;;  %4477 = vmatpush3.msra.mxu1 %v3497_v36 }
 0x1d7   : > { %4452 = vmatpush3.msra.mxu0 %v3483_v37  ;;  %4478 = vmatprep.subr.mxu1 %v3496_v38 }
 0x1d8   : > { %4453 = vmatprep.subr.mxu0 %v3482_v39  ;;  %4479 = vmatpush3.msra.mxu1 %v3496_v38 }
 0x1d9   : > { %4454 = vmatpush3.msra.mxu0 %v3482_v39  ;;  %4480 = vmatprep.subr.mxu1 %v3495_v40 }
 0x1da   : > { %4455 = vmatprep.subr.mxu0 %v3481_v41  ;;  %4481 = vmatpush3.msra.mxu1 %v3495_v40 }
 0x1db   : > { %4456 = vmatpush3.msra.mxu0 %v3481_v41  ;;  %4483 = vmatmul.mubr.msk.f32.vlgmr.msra.gmra.mxu1 %vm1620_vm6, %v2343_v42 }
 0x1dc   : > { %4458 = vmatmul.mubr.msk.f32.vlgmr.msra.gmra.mxu0 %vm1620_vm6, %v2343_v42  ;;  %4485 = vmatprep.subr.mxu0 %v4761_v43 }
 0x1dd   : > { %4508 = vmatprep.subr.mxu1 %v4761_v43  ;;  %4486 = vmatpush3.msra.mxu0 %v3519_v44 }
 0x1de   : > { %4509 = vmatpush3.msra.mxu1 %v2578_v45  ;;  %4487 = vmatprep.subr.mxu0 %v4761_v43 }
 0x1df   : > { %4510 = vmatprep.subr.mxu1 %v4761_v43  ;;  %4488 = vmatpush3.msra.mxu0 %v3518_v46 }
 0x1e0   : > { %4511 = vmatpush3.msra.mxu1 %v2577_v47  ;;  %4489 = vmatprep.subr.mxu0 %v4761_v43 }
 0x1e1   : > { %4512 = vmatprep.subr.mxu1 %v4761_v43  ;;  %4490 = vmatpush3.msra.mxu0 %v3517_v48 }
 0x1e2   : > { %4513 = vmatpush3.msra.mxu1 %v2576_v49  ;;  %4491 = vmatprep.subr.mxu0 %v4761_v43 }
 0x1e3   : > { %4514 = vmatprep.subr.mxu1 %v4761_v43  ;;  %4492 = vmatpush3.msra.mxu0 %v3516_v50 }
 0x1e4   : > { %4515 = vmatpush3.msra.mxu1 %v2575_v51  ;;  %4493 = vmatprep.subr.mxu0 %v4761_v43 }
 0x1e5   : > { %4516 = vmatprep.subr.mxu1 %v4761_v43  ;;  %4494 = vmatpush3.msra.mxu0 %v3515_v52  ;;  %v3531_v52 = vld [vmem:[%s6128_s7 + $0xe8] sm:$0xff] }
 0x1e6   : > { %4517 = vmatpush3.msra.mxu1 %v2574_v53  ;;  %4495 = vmatprep.subr.mxu0 %v4761_v43  ;;  %v3542_v53 = vld [vmem:[%s6128_s7 + $0x138] sm:$0xff] }
 0x1e7   : > { %4518 = vmatprep.subr.mxu1 %v4761_v43  ;;  %4496 = vmatpush3.msra.mxu0 %v3514_v54 }
 0x1e8   : > { %4519 = vmatpush3.msra.mxu1 %v2573_v55  ;;  %4497 = vmatprep.subr.mxu0 %v4761_v43 }
 0x1e9   : > { %4520 = vmatprep.subr.mxu1 %v4761_v43  ;;  %4498 = vmatpush3.msra.mxu0 %v3513_v56  ;;  %v3530_v56 = vld [vmem:[%s6128_s7 + $0xe0] sm:$0xff] }
 0x1ea   : > { %4521 = vmatpush3.msra.mxu1 %v2572_v57  ;;  %4499 = vmatprep.subr.mxu0 %v4761_v43  ;;  %v3541_v57 = vld [vmem:[%s6128_s7 + $0x130] sm:$0xff] }
 0x1eb   : > { %4522 = vmatprep.subr.mxu1 %v4761_v43  ;;  %4500 = vmatpush3.msra.mxu0 %v3512_v58  ;;  %v3529_v58 = vld [vmem:[%s6128_s7 + $0xd8] sm:$0xff] }
 0x1ec   : > { %4523 = vmatpush3.msra.mxu1 %v2571_v59  ;;  %4501 = vmatprep.subr.mxu0 %v4761_v43  ;;  %v3540_v59 = vld [vmem:[%s6128_s7 + $0x128] sm:$0xff] }
 0x1ed   : > { %4524 = vmatprep.subr.mxu1 %v4761_v43  ;;  %4502 = vmatpush3.msra.mxu0 %v3511_v60  ;;  %v3528_v60 = vld [vmem:[%s6128_s7 + $0xd0] sm:$0xff] }
 0x1ee   : > { %4525 = vmatpush3.msra.mxu1 %v2570_v61  ;;  %4503 = vmatprep.subr.mxu0 %v4761_v43  ;;  %v3539_v61 = vld [vmem:[%s6128_s7 + $0x120] sm:$0xff] }
 0x1ef   : > { %4526 = vmatprep.subr.mxu1 %v4761_v43  ;;  %4504 = vmatpush3.msra.mxu0 %v3510_v62  ;;  %v3527_v62 = vld [vmem:[%s6128_s7 + $0xc8] sm:$0xff] }
 0x1f0   : > { %4527 = vmatpush3.msra.mxu1 %v2569_v63  ;;  %4505 = vmatprep.mubr.msk.f32.mxu0 %vm4762_vm7, %v4761_v43  ;;  %v3538_v63 = vld [vmem:[%s6128_s7 + $0x118] sm:$0xff] }
 0x1f1   : > { %4528 = vmatprep.mubr.msk.f32.mxu1 %vm4762_vm7, %v4761_v43  ;;  %4531 = vmatprep.subr.mxu0 %v4761_v43 }
 0x1f2   : > { %4554 = vmatprep.subr.mxu1 %v4761_v43 }
 0x23c   : > { %v4284_v0 = vpop.f32.mrf.mxu1 }
 0x23d   : > { %v4259_v1 = vpop.f32.mrf.mxu0 }
 0x23e   : > { %v1781_v2 = vpop.f32.mrf.mxu1  ;;  %v1787_v15 = vadd.f32 %v4284_v0, %v4259_v1  ;;  %v3526_v0 = vld [vmem:[%s6128_s7 + $0xc0] sm:$0xff]  ;;  %v3537_v1 = vld [vmem:[%s6128_s7 + $0x110] sm:$0xff] }
 0x23f   : > { %v1697_v3 = vpop.f32.mrf.mxu0 }
 0x240   : > { %v1782_v18 = vadd.f32 %v1781_v2, %v1697_v3  ;;  %v3525_v2 = vld [vmem:[%s6128_s7 + $0xb8] sm:$0xff]  ;;  %v3536_v3 = vld [vmem:[%s6128_s7 + $0x108] sm:$0xff] }
 0x253   : > { %v4334_v4 = vpop.f32.mrf.mxu1 }
 0x254   : > { %v4309_v5 = vpop.f32.mrf.mxu0 }
 0x255   : > { %v1949_v6 = vpop.f32.mrf.mxu1  ;;  %v1955_v13 = vadd.f32 %v4334_v4, %v4309_v5  ;;  %v3524_v4 = vld [vmem:[%s6128_s7 + $0xb0] sm:$0xff]  ;;  %v3535_v5 = vld [vmem:[%s6128_s7 + $0x100] sm:$0xff] }
 0x256   : > { %v1871_v7 = vpop.f32.mrf.mxu0 }
 0x257   : > { %v1950_v16 = vadd.f32 %v1949_v6, %v1871_v7  ;;  %v3523_v6 = vld [vmem:[%s6128_s7 + $0xa8] sm:$0xff]  ;;  %v3534_v7 = vld [vmem:[%s6128_s7 + $0xf8] sm:$0xff] }
 0x26b   : > { %v4384_v8 = vpop.f32.mrf.mxu1 }
 0x26c   : > { %v4359_v9 = vpop.f32.mrf.mxu0  ;;  %v2149_v17 = vadd.f32 %v4384_v8, %v1955_v13  ;;  %v3522_v8 = vld [vmem:[%s6128_s7 + $0xa0] sm:$0xff] }
 0x26d   : > { %v2139_v10 = vpop.f32.mrf.mxu1  ;;  %v2057_v34 = vadd.f32 %v4359_v9, %v1787_v15  ;;  %v3533_v9 = vld [vmem:[%s6128_s7 + $0xf0] sm:$0xff]  ;;  %v3552_v13 = vld [vmem:[%s6128_s7 + $0x180] sm:$0xff] }
 0x26e   : > { %v2047_v11 = vpop.f32.mrf.mxu0  ;;  %v2148_v19 = vadd.f32 %v2139_v10, %v1950_v16  ;;  %v3550_v15 = vld [vmem:[%s6128_s7 + $0x170] sm:$0xff]  ;;  %v3549_v16 = vld [vmem:[%s6128_s7 + $0x168] sm:$0xff] }
 0x26f   : > { %v2056_v22 = vadd.f32 %v2047_v11, %v1782_v18  ;;  %v3547_v18 = vld [vmem:[%s6128_s7 + $0x158] sm:$0xff] }
 0x283   : > { %v4434_v12 = vpop.f32.mrf.mxu1 }
 0x284   : > { %v4409_v14 = vpop.f32.mrf.mxu0  ;;  %v2341_v20 = vadd.f32 %v4434_v12, %v2149_v17  ;;  %v3553_v12 = vld [vmem:[%s6128_s7 + $0x188] sm:$0xff]  ;;  %v3548_v17 = vld [vmem:[%s6128_s7 + $0x160] sm:$0xff] }
 0x285   : > { %v2331_v35 = vpop.f32.mrf.mxu1  ;;  %v2249_v23 = vadd.f32 %v4409_v14, %v2057_v34  ;;  %v3551_v14 = vld [vmem:[%s6128_s7 + $0x178] sm:$0xff]  ;;  %v3546_v34 = vld [vmem:[%s6128_s7 + $0x150] sm:$0xff] }
 0x286   : > { %v2239_v21 = vpop.f32.mrf.mxu0  ;;  %v2340_v26 = vadd.f32 %v2331_v35, %v2148_v19  ;;  %v3545_v35 = vld [vmem:[%s6128_s7 + $0x148] sm:$0xff]  ;;  %v3544_v19 = vld [vmem:[%s6128_s7 + $0x140] sm:$0xff] }
 0x287   : > { %v2248_v29 = vadd.f32 %v2239_v21, %v2056_v22  ;;  %v3013_v21 = vld [vmem:[%s6130_s9 + $0x70] sm:$0xff]  ;;  %v3012_v22 = vld [vmem:[%s6130_s9 + $0x68] sm:$0xff] }
 0x29b   : > { %v4484_v24 = vpop.f32.mrf.mxu1 }
 0x29c   : > { %v2533_v27 = vadd.f32 %v4484_v24, %v2341_v20  ;;  %v4459_v28 = vpop.f32.mrf.mxu0  ;;  %v3010_v24 = vld [vmem:[%s6130_s9 + $0x58] sm:$0xff] }
 0x29d   : > { %v2441_v30 = vadd.f32 %v4459_v28, %v2249_v23  ;;  %v2523_v31 = vpop.f32.mrf.mxu1  ;;  %v3011_v23 = vld [vmem:[%s6130_s9 + $0x60] sm:$0xff]  ;;  %v3006_v28 = vld [vmem:[%s6130_s9 + $0x38] sm:$0xff] }
 0x29e   : > { %v2546_v32 = vadd.f32 %v3509_v25, %v2533_v27  ;;  %v2532_v33 = vadd.f32 %v2523_v31, %v2340_v26  ;;  %v2431_v36 = vpop.f32.mrf.mxu0  ;;  %v3008_v26 = vld [vmem:[%s6130_s9 + $0x48] sm:$0xff]  ;;  %v3007_v27 = vld [vmem:[%s6130_s9 + $0x40] sm:$0xff] }
 0x29f   : > { %v2542_v37 = vadd.f32 %v3509_v25, %v2441_v30  ;;  %v2440_v38 = vadd.f32 %v2431_v36, %v2248_v29  ;;  %v3005_v29 = vld [vmem:[%s6130_s9 + $0x30] sm:$0xff]  ;;  %v3004_v30 = vld [vmem:[%s6130_s9 + $0x28] sm:$0xff]  ;;  %v3003_v31 = vld [vmem:[%s6130_s9 + $0x20] sm:$0xff] }
 0x2a0   : > { %v2548_v39 = vmax.f32 %v2546_v32, 0.0  ;;  %v2545_v40 = vadd.f32 %v3509_v25, %v2532_v33  ;;  %v3002_v32 = vld [vmem:[%s6130_s9 + $0x18] sm:$0xff]  ;;  %v3001_v33 = vld [vmem:[%s6130_s9 + $0x10] sm:$0xff]  ;;  %v3000_v36 = vld [vmem:[%s6130_s9 + $0x8] sm:$0xff] }
 0x2a1   : > { %v2544_v41 = vmax.f32 %v2542_v37, 0.0  ;;  %v2541_v42 = vadd.f32 %v3509_v25, %v2440_v38  ;;  %v3009_v25 = vld [vmem:[%s6130_s9 + $0x50] sm:$0xff]  ;;  %v2999_v37 = vld [vmem:[%s6130_s9] sm:$0xff] }
 0x2a2   : > { %v2547_v44 = vmax.f32 %v2545_v40, 0.0  ;;  %v3100_v38 = vld [vmem:[%s6132_s11 + $0x50] sm:$0xf]  ;;  %v3098_v40 = vld [vmem:[%s6132_s11 + $0x40] sm:$0xff] }
 0x2a3   : > { %v2550_v45 = vmax.f32 %v2544_v41, %v2548_v39  ;;  %v2543_v46 = vmax.f32 %v2541_v42, 0.0  ;;  %v3099_v39 = vld [vmem:[%s6132_s11 + $0x48] sm:$0xff]  ;;  %v3097_v41 = vld [vmem:[%s6132_s11 + $0x38] sm:$0xff]  ;;  %v3096_v42 = vld [vmem:[%s6132_s11 + $0x30] sm:$0xff] }
 0x2a5   : > { %v2564_v47 = vrot.slane %v2550_v45, 1  ;;  %v2549_v48 = vmax.f32 %v2543_v46, %v2547_v44  ;;  %v3095_v44 = vld [vmem:[%s6132_s11 + $0x28] sm:$0xff]  ;;  %v3093_v46 = vld [vmem:[%s6132_s11 + $0x18] sm:$0xff] }
 0x2a7   : > { %v2566_v49 = vmax.f32 %v2550_v45, %v2564_v47  ;;  %v2552_v50 = vrot.slane %v2549_v48, 1  ;;  %v3094_v45 = vld [vmem:[%s6132_s11 + $0x20] sm:$0xff] }
 0x2a9   : > { %2567 = vst.msk [vmem:[#allocation3 + $0x4] sm:$0x1] %vm2555_vm8, %v2566_v49  ;;  %v2554_v51 = vmax.f32 %v2549_v48, %v2552_v50 }
 0x2ab   : > { %2556 = vst.msk [vmem:[#allocation3] sm:$0x1] %vm2555_vm8, %v2554_v51 }
 0x2ac   : > { %2558 = vst.msk [vmem:[#allocation3 - $0x1] sm:$0x4] %vm2557_vm9, %v2554_v51 }
 0x2ad   : > { %2560 = vst.msk [vmem:[#allocation3 - $0x2] sm:$0x10] %vm2559_vm10, %v2554_v51 }
 0x2ae   : > { %2562 = vst.msk [vmem:[#allocation3 - $0x3] sm:$0x40] %vm2561_vm11, %v2554_v51 }
 0x2b0   : > { %v2910_v20 = vld [vmem:[#allocation3 + $0x4] sm:$0x1] }
 0x2b2   : > { %v2568_v55 = vld [vmem:[#allocation3] sm:$0x1] }
 0x2b3   : > { %v2579_v54 = vld [vmem:[#allocation3 + $0x1] sm:$0x1]  ;;  %4529 = vmatmul.mubr.msk.f32.vlgmr.msra.gmra.mxu1 %vm2591_vm12, %v2568_v55 }
 0x2b4   : > { %4506 = vmatmul.mubr.msk.f32.vlgmr.msra.gmra.mxu0 %vm2591_vm12, %v2579_v54  ;;  %4555 = vmatpush3.msra.mxu1 %v3542_v53  ;;  %v2738_v10 = vld [vmem:[#allocation3 + $0x2] sm:$0x1] }
 0x2b5   : > { %4532 = vmatpush3.msra.mxu0 %v3531_v52  ;;  %4556 = vmatprep.subr.mxu1 %v4761_v43  ;;  %v2824_v11 = vld [vmem:[#allocation3 + $0x3] sm:$0x1] }
 0x2b6   : > { %4533 = vmatprep.subr.mxu0 %v4761_v43  ;;  %4557 = vmatpush3.msra.mxu1 %v3541_v57 }
 0x2b7   : > { %4534 = vmatpush3.msra.mxu0 %v3530_v56  ;;  %4558 = vmatprep.subr.mxu1 %v4761_v43 }
 0x2b8   : > { %4535 = vmatprep.subr.mxu0 %v4761_v43  ;;  %4559 = vmatpush3.msra.mxu1 %v3540_v59  ;;  %v2996_v59 = vld [vmem:[%s6129_s8] sm:$0x1] }
 0x2b9   : > { %4536 = vmatpush3.msra.mxu0 %v3529_v58  ;;  %4560 = vmatprep.subr.mxu1 %v4761_v43 }
 0x2ba   : > { %4537 = vmatprep.subr.mxu0 %v4761_v43  ;;  %4561 = vmatpush3.msra.mxu1 %v3539_v61 }
 0x2bb   : > { %4538 = vmatpush3.msra.mxu0 %v3528_v60  ;;  %4562 = vmatprep.subr.mxu1 %v4761_v43 }
 0x2bc   : > { %4539 = vmatprep.subr.mxu0 %v4761_v43  ;;  %4563 = vmatpush3.msra.mxu1 %v3538_v63 }
 0x2bd   : > { %4540 = vmatpush3.msra.mxu0 %v3527_v62  ;;  %4564 = vmatprep.subr.mxu1 %v4761_v43 }
 0x2be   : > { %4541 = vmatprep.subr.mxu0 %v4761_v43  ;;  %4565 = vmatpush3.msra.mxu1 %v3537_v1  ;;  %v3091_v1 = vld [vmem:[%s6132_s11 + $0x8] sm:$0xff] }
 0x2bf   : > { %4542 = vmatpush3.msra.mxu0 %v3526_v0  ;;  %4566 = vmatprep.subr.mxu1 %v4761_v43  ;;  %v3092_v0 = vld [vmem:[%s6132_s11 + $0x10] sm:$0xff] }
 0x2c0   : > { %4543 = vmatprep.subr.mxu0 %v4761_v43  ;;  %4567 = vmatpush3.msra.mxu1 %v3536_v3  ;;  %v3014_v3 = vld [vmem:[%s6131_s10] sm:$0x1] }
 0x2c1   : > { %4544 = vmatpush3.msra.mxu0 %v3525_v2  ;;  %4568 = vmatprep.subr.mxu1 %v4761_v43  ;;  %v3090_v2 = vld [vmem:[%s6132_s11] sm:$0xff] }
 0x2c2   : > { %4545 = vmatprep.subr.mxu0 %v4761_v43  ;;  %4569 = vmatpush3.msra.mxu1 %v3535_v5 }
 0x2c3   : > { %4546 = vmatpush3.msra.mxu0 %v3524_v4  ;;  %4570 = vmatprep.subr.mxu1 %v4761_v43 }
 0x2c4   : > { %4547 = vmatprep.subr.mxu0 %v4761_v43  ;;  %4571 = vmatpush3.msra.mxu1 %v3534_v7 }
 0x2c5   : > { %4548 = vmatpush3.msra.mxu0 %v3523_v6  ;;  %4572 = vmatprep.subr.mxu1 %v4761_v43 }
 0x2c6   : > { %4549 = vmatprep.subr.mxu0 %v4761_v43  ;;  %4551 = vmatprep.mubr.msk.f32.mxu0 %vm4762_vm7, %v4761_v43 }
 0x2c7   : > { %4550 = vmatpush3.msra.mxu0 %v3522_v8  ;;  %4573 = vmatpush3.msra.mxu1 %v3533_v9 }
 0x2c8   : > { %4574 = vmatprep.mubr.msk.f32.mxu1 %vm4762_vm7, %v4761_v43  ;;  %4552 = vmatmul.mubr.msk.f32.vlgmr.msra.gmra.mxu0 %vm2591_vm12, %v2738_v10 }
 0x2c9   : > { %4575 = vmatmul.mubr.msk.f32.vlgmr.msra.gmra.mxu1 %vm2591_vm12, %v2824_v11  ;;  %4577 = vmatprep.subr.mxu0 %v4761_v43 }
 0x2ca   : > { %4597 = vmatprep.mubr.msk.f32.mxu0 %vm4762_vm7, %v4761_v43  ;;  %4578 = vmatpush3.msra.mxu0 %v3553_v12 }
 0x2cb   : > { %4600 = vmatprep.subr.mxu1 %v4761_v43  ;;  %4579 = vmatprep.subr.mxu0 %v4761_v43 }
 0x2cc   : > { %4630 = vmatprep.mubr.msk.f32.mxu1 %vm4762_vm7, %v4761_v43  ;;  %4580 = vmatpush3.msra.mxu0 %v3552_v13 }
 0x2cd   : > { %4581 = vmatprep.subr.mxu0 %v4761_v43  ;;  %4601 = vmatpush3.msra.mxu1 %v3013_v21 }
 0x2ce   : > { %4582 = vmatpush3.msra.mxu0 %v3551_v14  ;;  %4602 = vmatprep.subr.mxu1 %v4761_v43 }
 0x2cf   : > { %4583 = vmatprep.subr.mxu0 %v4761_v43  ;;  %4603 = vmatpush3.msra.mxu1 %v3012_v22 }
 0x2d0   : > { %4584 = vmatpush3.msra.mxu0 %v3550_v15  ;;  %4604 = vmatprep.subr.mxu1 %v4761_v43 }
 0x2d1   : > { %4585 = vmatprep.subr.mxu0 %v4761_v43  ;;  %4605 = vmatpush3.msra.mxu1 %v3011_v23 }
 0x2d2   : > { %4586 = vmatpush3.msra.mxu0 %v3549_v16  ;;  %4606 = vmatprep.subr.mxu1 %v4761_v43 }
 0x2d3   : > { %4587 = vmatprep.subr.mxu0 %v4761_v43  ;;  %4607 = vmatpush3.msra.mxu1 %v3010_v24 }
 0x2d4   : > { %4588 = vmatpush3.msra.mxu0 %v3548_v17  ;;  %4608 = vmatprep.subr.mxu1 %v4761_v43 }
 0x2d5   : > { %4589 = vmatprep.subr.mxu0 %v4761_v43  ;;  %4609 = vmatpush3.msra.mxu1 %v3009_v25 }
 0x2d6   : > { %4590 = vmatpush3.msra.mxu0 %v3547_v18  ;;  %4610 = vmatprep.subr.mxu1 %v4761_v43 }
 0x2d7   : > { %4591 = vmatprep.subr.mxu0 %v4761_v43  ;;  %4611 = vmatpush3.msra.mxu1 %v3008_v26 }
 0x2d8   : > { %4592 = vmatpush3.msra.mxu0 %v3546_v34  ;;  %4612 = vmatprep.subr.mxu1 %v4761_v43 }
 0x2d9   : > { %4593 = vmatprep.subr.mxu0 %v4761_v43  ;;  %4613 = vmatpush3.msra.mxu1 %v3007_v27 }
 0x2da   : > { %4594 = vmatpush3.msra.mxu0 %v3545_v35  ;;  %4614 = vmatprep.subr.mxu1 %v4761_v43 }
 0x2db   : > { %4595 = vmatprep.subr.mxu0 %v4761_v43  ;;  %4615 = vmatpush3.msra.mxu1 %v3006_v28 }
 0x2dc   : > { %4596 = vmatpush3.msra.mxu0 %v3544_v19  ;;  %4616 = vmatprep.subr.mxu1 %v4761_v43 }
 0x2dd   : > { %4598 = vmatmul.mubr.msk.f32.vlgmr.msra.gmra.mxu0 %vm2591_vm12, %v2910_v20  ;;  %4633 = vmatprep.subr.mxu0 %v4761_v43 }
 0x2de   : > { %4655 = vmatprep.mubr.msk.f32.mxu0 %vm4762_vm7, %v4761_v43  ;;  %4617 = vmatpush3.msra.mxu1 %v3005_v29 }
 0x2df   : > { %4618 = vmatprep.subr.mxu1 %v4761_v43  ;;  %4634 = vmatpush3.msk.msra.mxu0 %vm1627_vm1, %v3100_v38 }
 0x2e0   : > { %4619 = vmatpush3.msra.mxu1 %v3004_v30  ;;  %4635 = vmatprep.subr.mxu0 %v4761_v43 }
 0x2e1   : > { %4620 = vmatprep.subr.mxu1 %v4761_v43  ;;  %4636 = vmatpush3.msra.mxu0 %v3099_v39 }
 0x2e2   : > { %4621 = vmatpush3.msra.mxu1 %v3003_v31  ;;  %4637 = vmatprep.subr.mxu0 %v4761_v43 }
 0x2e3   : > { %4622 = vmatprep.subr.mxu1 %v4761_v43  ;;  %4638 = vmatpush3.msra.mxu0 %v3098_v40 }
 0x2e4   : > { %4623 = vmatpush3.msra.mxu1 %v3002_v32  ;;  %4639 = vmatprep.subr.mxu0 %v4761_v43 }
 0x2e5   : > { %4624 = vmatprep.subr.mxu1 %v4761_v43  ;;  %4640 = vmatpush3.msra.mxu0 %v3097_v41 }
 0x2e6   : > { %4625 = vmatpush3.msra.mxu1 %v3001_v33  ;;  %4641 = vmatprep.subr.mxu0 %v4761_v43 }
 0x2e7   : > { %4626 = vmatprep.subr.mxu1 %v4761_v43  ;;  %4642 = vmatpush3.msra.mxu0 %v3096_v42 }
 0x2e8   : > { %4627 = vmatpush3.msra.mxu1 %v3000_v36  ;;  %4643 = vmatprep.subr.mxu0 %v4761_v43 }
 0x2e9   : > { %4628 = vmatprep.subr.mxu1 %v4761_v43  ;;  %4644 = vmatpush3.msra.mxu0 %v3095_v44 }
 0x2ea   : > { %4629 = vmatpush3.msra.mxu1 %v2999_v37  ;;  %4645 = vmatprep.subr.mxu0 %v4761_v43 }
 0x2eb   : > { %4646 = vmatpush3.msra.mxu0 %v3094_v45 }
 0x2ec   : > { %4647 = vmatprep.subr.mxu0 %v4761_v43 }
 0x2ed   : > { %4648 = vmatpush3.msra.mxu0 %v3093_v46 }
 0x2ee   : > { %4649 = vmatprep.subr.mxu0 %v4761_v43 }
 0x2ef   : > { %4650 = vmatpush3.msra.mxu0 %v3092_v0 }
 0x2f0   : > { %4651 = vmatprep.subr.mxu0 %v4761_v43 }
 0x2f1   : > { %4652 = vmatpush3.msra.mxu0 %v3091_v1 }
 0x2f2   : > { %4653 = vmatprep.subr.mxu0 %v4761_v43  ;;  %v3101_v43 = vld [vmem:[%s6133_s12] sm:$0x1] }
 0x2f3   : > { %4654 = vmatpush3.msra.mxu0 %v3090_v2 }
 0x373   : > { %v2734_v48 = vpop.f32.mrf.mxu1 }
 0x374   : > { %v2661_v47 = vpop.f32.mrf.mxu0 }
 0x375   : > { %v4530_v50 = vpop.f32.mrf.mxu1  ;;  %v2735_v55 = vadd.f32 %v2734_v48, %v2661_v47 }
 0x376   : > { %v4507_v49 = vpop.f32.mrf.mxu0 }
 0x388   : > { %v2819_v51 = vpop.f32.mrf.mxu0 }
 0x389   : > { %v2905_v52 = vpop.f32.mrf.mxu1  ;;  %v2823_v56 = vadd.f32 %v2819_v51, %v2735_v55 }
 0x38a   : > { %v4553_v53 = vpop.f32.mrf.mxu0 }
 0x38b   : > { %v4576_v54 = vpop.f32.mrf.mxu1  ;;  %v2909_v57 = vadd.f32 %v2905_v52, %v2823_v56 }
 0x39d   : > { %v2991_v58 = vpop.f32.mrf.mxu0 }
 0x39e   : > { %v2995_v60 = vadd.f32 %v2991_v58, %v2909_v57 }
 0x39f   : > { %v4599_v61 = vpop.f32.mrf.mxu0 }
 0x3a0   : > { %v2997_v62 = vadd.f32 %v2996_v59, %v2995_v60 }
 0x3a2   : > { %v2998_v63 = vmax.f32 %v2997_v62, 0.0 }
 0x3a4   : > { %4631 = vmatmul.mubr.msk.f32.vlgmr.msra.gmra.mxu1 %vm3015_vm13, %v2998_v63 }
 0x464   : > { %v3085_v4 = vpop.f32.mrf.mxu1 }
 0x465   : > { %v3086_v5 = vadd.f32 %v3085_v4, %v3014_v3 }
 0x466   : > { %v4632_v6 = vpop.f32.mrf.mxu1 }
 0x467   : > { %v3089_v7 = vmax.f32 %v3086_v5, 0.0 }
 0x469   : > { %4656 = vmatmul.mubr.msk.f32.vlgmr.msra.gmra.mxu0 %vm1620_vm6, %v3089_v7 }
 0x529   : > { %v3174_v8 = vpop.f32.mrf.mxu0 }
 0x52a   : > { %v3175_v9 = vadd.f32 %v3174_v8, %v3101_v43 }
 0x52b   : > { %v4657_v10 = vpop.f32.mrf.mxu0 }
 0x52c   : > { %3179 = vst.msk [vmem:[%s432_s17] sm:$0x1] %vm3178_vm14, %v3175_v9 }
 0x52d   : > { %4712 = shalt.err (!%p4709_p3)
}
 0x52e   : > { %s4713_s14 = scalar_lea.hbm %s6086_s27, 16  ;;  %s4717_s30 = scalar_lea.hbm %s6134_s13, 32 }
 0x52f   : > { %p4714_p4 = scmp.ne.s32.totalorder %s6086_s27, %s4713_s14  ;;  %p4718_p9 = scmp.lt.s32.totalorder %s6086_s27, %s6134_s13 }
 0x530   : > { %p4719_p10 = scmp.lt.s32.totalorder %s4717_s30, %s4713_s14 }
 0x531   : > { %p4715_p7 = pnand %p4714_p4, %p4872_p5 }
 0x532   : > { %p4720_p11 = por %p4719_p10, %p4718_p9 }
 0x533   : > { %p4716_p8 = pneg %p4715_p7 }
 0x535   : > { %p4721_p12 = pnand %p4720_p11, %p4716_p8 }
 0x537   : > { %4724 = shalt.err (!%p4721_p12)
}
 0x538   : > { %4658 = dma.vmem_to_hbm [thread:$0]  (%p4872_p5), %s3194_s24, 16, %s6086_s27, %s3181_s16  }
 0x539 PF: > { %p4664_p13 = scmp.ge.s32.totalorder %s4759_s28, 2  ;;  %s3205_s20 = sand.u32 1, %s4747_s25  }
 0x53a   : > { %s3206_s22 = scalar_lea.sflag [#allocation5], %s3205_s20 }
 0x53b   : > { %p4661_p0 = pnand %p4664_p13, %p4876_p6 }
 0x53d   : > { %p4662_p1 = pneg %p4661_p0 }
 0x53f   : > { %4742 = dma.done.wait (%p4662_p1), %s3206_s22, 16  }
 0x540   : > { %4744 = vsyncadd (%p4662_p1), %s3206_s22, 4294967280  ;;  %s6143_s28 = sld [smem:[#allocation8_spill]]  ;;  %s6146_s25 = smov %s4751_s26 }
 0x541   : > { %s6144_s23 = sld [smem:[#allocation7_spill]] }
 0x542   : > { %s6145_s27 = sld [smem:[#allocation9_spill]] }
 0x546   : > { %p23_p2 = scmp.ge.s32.totalorder %s6143_s28, 4  }
 0x547   : > { %s6147_s26 = smov %s6144_s23 }
 0x548   :  { %25 = sbr.rel (!%p23_p2) target bundleno = 3 (0x3), region = 127 }
 0x54d   :  { %3210 = vsyncpa [#allocation5], 1 }
 0x54e   :  { %3212 = vsyncpa [#allocation5 + $0x1], 1 }

</bundles_post_ra>
